<compile_context>
chip_gen: v5e
topology: v5e:2x2
jax: 0.10.0
libtpu: 0.0.40
codegen_flags: <defaults>
</compile_context>

<pallas_src>
import math
import functools

import jax
import jax.numpy as jnp
from jax.experimental import pallas as pl
from jax.experimental.pallas import tpu as pltpu


# ----------------------------------------------------------------------------
# Shared math helpers (used both inside the kernel and in the f32 reference).
# ----------------------------------------------------------------------------
def _layer_norm(x, gamma, beta, eps=1e-5):
    mean = jnp.mean(x, axis=-1, keepdims=True)
    var = jnp.mean(jnp.square(x - mean), axis=-1, keepdims=True)
    return (x - mean) * jax.lax.rsqrt(var + eps) * gamma + beta


def position_encoding(sent_len, d_embedding):
    # Matches the PyTorch PositionEncoder: positions 1..sent_len.
    position = jnp.arange(1, sent_len + 1, dtype=jnp.float32)[:, None]
    div_term = jnp.exp(
        jnp.arange(0, d_embedding, 2, dtype=jnp.float32)
        * (-math.log(10000.0) / d_embedding)
    )
    pe = jnp.zeros((sent_len, d_embedding), jnp.float32)
    pe = pe.at[:, 0::2].set(jnp.sin(position * div_term))
    if d_embedding % 2 == 0:
        pe = pe.at[:, 1::2].set(jnp.cos(position * div_term))
    else:
        pe = pe.at[:, 1::2].set(jnp.cos(position * div_term)[:, :-1])
    return pe


# ----------------------------------------------------------------------------
# Fused kernel: embedding-combine prologue + all encoder layers, x resident in VMEM.
# ----------------------------------------------------------------------------
def _fused_transformer_kernel(
    tok_ref, pos_ref, seg_ref,
    wqkv_ref, bqkv_ref, wo_ref, bo_ref,
    g1_ref, be1_ref, w1_ref, b1_ref, w2_ref, b2_ref, g2_ref, be2_ref,
    out_ref, x_scr,
    *, n_heads, embed_scale,
):
    layer = pl.program_id(0)
    B, S, D = tok_ref.shape
    BS = B * S
    Dh = D // n_heads
    score_scale = 1.0 / math.sqrt(Dh)

    # --- layer-0 prologue: combine embeddings, park activation in VMEM scratch ---
    @pl.when(layer == 0)
    def _():
        x0 = tok_ref[...] * embed_scale + pos_ref[...][None, :, :] + seg_ref[...]
        x_scr[...] = x0.reshape(BS, D)

    x = x_scr[...]                       # (B*S, D) f32, resident across layers
    x_bf = x.astype(jnp.bfloat16)

    # --- multi-head self-attention ---
    # Heads unrolled (static), batch handled with an einsum batch dim; head concat is
    # folded away by accumulating each head's output through its out-projection slice.
    attn = jnp.zeros((BS, D), jnp.float32)
    for h in range(n_heads):
        q = jnp.dot(x_bf, wqkv_ref[0, h],
                    preferred_element_type=jnp.float32) + bqkv_ref[0, h]
        k = jnp.dot(x_bf, wqkv_ref[0, n_heads + h],
                    preferred_element_type=jnp.float32) + bqkv_ref[0, n_heads + h]
        v = jnp.dot(x_bf, wqkv_ref[0, 2 * n_heads + h],
                    preferred_element_type=jnp.float32) + bqkv_ref[0, 2 * n_heads + h]
        q3 = q.reshape(B, S, Dh)
        k3 = k.reshape(B, S, Dh)
        v3 = v.reshape(B, S, Dh)

        s = jnp.einsum("bqd,bkd->bqk",
                       q3.astype(jnp.bfloat16), k3.astype(jnp.bfloat16),
                       preferred_element_type=jnp.float32) * score_scale
        s = s - jnp.max(s, axis=-1, keepdims=True)
        p = jnp.exp(s)
        p = p * pl.reciprocal(jnp.sum(p, axis=-1, keepdims=True), approx=True)

        o = jnp.einsum("bqk,bkd->bqd",
                       p.astype(jnp.bfloat16), v3.astype(jnp.bfloat16),
                       preferred_element_type=jnp.float32)
        attn = attn + jnp.dot(o.reshape(BS, Dh).astype(jnp.bfloat16), wo_ref[0, h],
                              preferred_element_type=jnp.float32)
    attn = attn + bo_ref[0]

    # residual + post-norm 1 (f32)
    x1 = _layer_norm(x + attn, g1_ref[0], be1_ref[0])

    # --- feed-forward (ReLU) ---
    ff = jnp.dot(x1.astype(jnp.bfloat16), w1_ref[0],
                 preferred_element_type=jnp.float32) + b1_ref[0]
    ff = jnp.maximum(ff, 0.0)
    ff = jnp.dot(ff.astype(jnp.bfloat16), w2_ref[0],
                 preferred_element_type=jnp.float32) + b2_ref[0]

    # residual + post-norm 2 (f32); keep resident for the next layer
    x2 = _layer_norm(x1 + ff, g2_ref[0], be2_ref[0])
    x_scr[...] = x2

    @pl.when(layer == pl.num_programs(0) - 1)
    def _():
        out_ref[...] = x2.reshape(B, S, D)


def transformer_stack(tok, pos, seg, params, *, n_heads, d_embedding):
    B, S, D = tok.shape
    L = params["wqkv"].shape[0]
    H = params["w1"].shape[-1]
    Dh = D // n_heads

    def whole_spec(arr):
        zeros = (0,) * arr.ndim
        return pl.BlockSpec(arr.shape, lambda l: zeros)

    def layer_spec(arr):
        zeros = (0,) * (arr.ndim - 1)
        return pl.BlockSpec((1,) + arr.shape[1:], lambda l: (l,) + zeros)

    layer_arrays = [params[k] for k in
                    ("wqkv", "bqkv", "wo", "bo", "ln1_g", "ln1_b",
                     "w1", "b1", "w2", "b2", "ln2_g", "ln2_b")]
    in_arrays = [tok, pos, seg] + layer_arrays
    in_specs = ([whole_spec(tok), whole_spec(pos), whole_spec(seg)]
                + [layer_spec(a) for a in layer_arrays])

    flops_per_layer = (
        2 * B * S * D * 3 * D                 # q/k/v projections
        + 2 * 2 * B * n_heads * S * S * Dh    # scores + probs@v
        + 2 * B * S * D * D                   # output projection
        + 2 * 2 * B * S * D * H               # FFN
    )
    bytes_accessed = (sum(int(a.size) * a.dtype.itemsize for a in in_arrays)
                      + B * S * D * 4)

    return pl.pallas_call(
        functools.partial(_fused_transformer_kernel,
                          n_heads=n_heads, embed_scale=math.sqrt(d_embedding)),
        out_shape=jax.ShapeDtypeStruct((B, S, D), jnp.float32),
        grid=(L,),
        in_specs=in_specs,
        out_specs=pl.BlockSpec((B, S, D), lambda l: (0, 0, 0)),
        scratch_shapes=[pltpu.VMEM((B * S, D), jnp.float32)],
        compiler_params=pltpu.CompilerParams(dimension_semantics=("arbitrary",)),
        cost_estimate=pl.CostEstimate(
            flops=L * flops_per_layer,
            transcendentals=L * B * n_heads * S * S,
            bytes_accessed=bytes_accessed,
        ),
    )(*in_arrays)


# ----------------------------------------------------------------------------
# Parameters & forward pass.
# ----------------------------------------------------------------------------
def init_params(key, vocab_size, sent_len, d_embedding, d_hidden, n_layers, n_heads):
    D, H, L, nH = d_embedding, d_hidden, n_layers, n_heads
    Dh = D // nH
    keys = jax.random.split(key, 2 + 4 * L)
    wqkv, wo, w1, w2 = [], [], [], []
    for l in range(L):
        k = keys[2 + 4 * l: 2 + 4 * (l + 1)]
        # y = x @ W corresponds to PyTorch's x @ W^T; per-head slicing done here (free).
        w_in = 0.05 * jax.random.normal(k[0], (D, 3 * D), jnp.float32)  # in_proj_weight.T
        wo_t = 0.05 * jax.random.normal(k[1], (D, D), jnp.float32)      # out_proj.weight.T
        wqkv.append(w_in.reshape(D, 3, nH, Dh).transpose(1, 2, 0, 3).reshape(3 * nH, D, Dh))
        wo.append(wo_t.reshape(nH, Dh, D))
        w1.append(0.05 * jax.random.normal(k[2], (D, H), jnp.float32))
        w2.append(0.05 * jax.random.normal(k[3], (H, D), jnp.float32))
    return {
        "token_embedding": 0.05 * jax.random.normal(keys[0], (vocab_size, D), jnp.float32),
        "segment_embedding": 0.05 * jax.random.normal(keys[1], (3, D), jnp.float32),
        "pos_encoding": position_encoding(sent_len, D),
        # Matmul weights stored in bf16 (MXU-native, half the weight DMA bytes);
        # biases / layernorm params and all accumulation stay f32.
        "wqkv": jnp.stack(wqkv).astype(jnp.bfloat16),      # (L, 3*nH, D, Dh)
        "bqkv": jnp.zeros((L, 3 * nH, 1, Dh), jnp.float32),
        "wo": jnp.stack(wo).astype(jnp.bfloat16),          # (L, nH, Dh, D)
        "bo": jnp.zeros((L, 1, D), jnp.float32),
        "ln1_g": jnp.ones((L, 1, D), jnp.float32),
        "ln1_b": jnp.zeros((L, 1, D), jnp.float32),
        "w1": jnp.stack(w1).astype(jnp.bfloat16),          # (L, D, H)
        "b1": jnp.zeros((L, 1, H), jnp.float32),
        "w2": jnp.stack(w2).astype(jnp.bfloat16),          # (L, H, D)
        "b2": jnp.zeros((L, 1, D), jnp.float32),
        "ln2_g": jnp.ones((L, 1, D), jnp.float32),
        "ln2_b": jnp.zeros((L, 1, D), jnp.float32),
    }


def triple_transformer_forward(params, t_lang, t_mind, t_world, *, d_embedding, n_heads):
    # Segment ids: lang -> 0, mind -> 1, world -> 2.
    seg_cat = jnp.concatenate(
        [jnp.zeros_like(t_lang), jnp.zeros_like(t_mind) + 1, jnp.zeros_like(t_world) + 2],
        axis=1,
    )
    t_cat = jnp.concatenate([t_lang, t_mind, t_world], axis=1)
    # Embedding-table gathers stay in plain JAX; everything else is one Pallas kernel.
    tok = jnp.take(params["token_embedding"], t_cat, axis=0)      # (B, S, D)
    seg = jnp.take(params["segment_embedding"], seg_cat, axis=0)  # (B, S, D)
    return transformer_stack(tok, params["pos_encoding"], seg, params,
                             n_heads=n_heads, d_embedding=d_embedding)


# ----------------------------------------------------------------------------
# Pure-f32 JAX reference (for an in-script sanity check of the kernel).
# ----------------------------------------------------------------------------
def reference_forward(params, t_lang, t_mind, t_world, *, d_embedding, n_heads):
    D, nH = d_embedding, n_heads
    Dh = D // nH
    seg_cat = jnp.concatenate(
        [jnp.zeros_like(t_lang), jnp.zeros_like(t_mind) + 1, jnp.zeros_like(t_world) + 2],
        axis=1,
    )
    t_cat = jnp.concatenate([t_lang, t_mind, t_world], axis=1)
    tok = jnp.take(params["token_embedding"], t_cat, axis=0)
    seg = jnp.take(params["segment_embedding"], seg_cat, axis=0)
    x = tok * math.sqrt(D) + params["pos_encoding"][None] + seg
    L = params["wqkv"].shape[0]
    for l in range(L):
        wqkv = params["wqkv"][l].astype(jnp.float32)
        bqkv = params["bqkv"][l]
        wo = params["wo"][l].astype(jnp.float32)
        attn = jnp.zeros_like(x)
        for h in range(nH):
            q = x @ wqkv[h] + bqkv[h]
            k = x @ wqkv[nH + h] + bqkv[nH + h]
            v = x @ wqkv[2 * nH + h] + bqkv[2 * nH + h]
            s = jnp.einsum("bqd,bkd->bqk", q, k) / math.sqrt(Dh)
            p = jax.nn.softmax(s, axis=-1)
            attn = attn + jnp.einsum("bqk,bkd->bqd", p, v) @ wo[h]
        attn = attn + params["bo"][l]
        x1 = _layer_norm(x + attn, params["ln1_g"][l], params["ln1_b"][l])
        ff = jnp.maximum(x1 @ params["w1"][l].astype(jnp.float32) + params["b1"][l], 0.0)
        ff = ff @ params["w2"][l].astype(jnp.float32) + params["b2"][l]
        x = _layer_norm(x1 + ff, params["ln2_g"][l], params["ln2_b"][l])
    return x


if __name__ == "__main__":
    vocab_size = 16
    lang_len = 4
    world_len = 2
    sent_len = lang_len + 2 * world_len      # 8
    d_embedding = 32
    d_hidden = 64
    n_layers = 2
    n_heads = 4
    batch = 2

    key = jax.random.PRNGKey(0)
    k_param, k_lang, k_mind, k_world = jax.random.split(key, 4)

    params = init_params(k_param, vocab_size, sent_len, d_embedding, d_hidden,
                         n_layers, n_heads)

    t_lang = jax.random.randint(k_lang, (batch, lang_len), 0, vocab_size, dtype=jnp.int32)
    t_mind = jax.random.randint(k_mind, (batch, world_len), 0, vocab_size, dtype=jnp.int32)
    t_world = jax.random.randint(k_world, (batch, world_len), 0, vocab_size, dtype=jnp.int32)

    fwd = jax.jit(functools.partial(triple_transformer_forward,
                                    d_embedding=d_embedding, n_heads=n_heads))
    out = jax.block_until_ready(fwd(params, t_lang, t_mind, t_world))

    assert out.shape == (batch, sent_len, d_embedding), out.shape
    assert out.dtype == jnp.float32
    assert bool(jnp.all(jnp.isfinite(out)))

    ref = reference_forward(params, t_lang, t_mind, t_world,
                            d_embedding=d_embedding, n_heads=n_heads)
    max_err = float(jnp.max(jnp.abs(out - ref)))
    assert max_err < 0.1, f"kernel deviates from f32 reference: max_err={max_err}"

    print("KERNEL_OK")
</pallas_src>

<mosaic_0001>
module attributes {stable_mosaic.version = 11 : i64} {
  func.func @_fused_transformer_kernel(%arg0: i32, %arg1: memref<2x8x32xf32, #tpu.memory_space<vmem>>, %arg2: memref<8x32xf32, #tpu.memory_space<vmem>>, %arg3: memref<2x8x32xf32, #tpu.memory_space<vmem>>, %arg4: memref<1x12x32x8xbf16, #tpu.memory_space<vmem>>, %arg5: memref<1x12x1x8xf32, #tpu.memory_space<vmem>>, %arg6: memref<1x4x8x32xbf16, #tpu.memory_space<vmem>>, %arg7: memref<1x1x32xf32, #tpu.memory_space<vmem>>, %arg8: memref<1x1x32xf32, #tpu.memory_space<vmem>>, %arg9: memref<1x1x32xf32, #tpu.memory_space<vmem>>, %arg10: memref<1x32x64xbf16, #tpu.memory_space<vmem>>, %arg11: memref<1x1x64xf32, #tpu.memory_space<vmem>>, %arg12: memref<1x64x32xbf16, #tpu.memory_space<vmem>>, %arg13: memref<1x1x32xf32, #tpu.memory_space<vmem>>, %arg14: memref<1x1x32xf32, #tpu.memory_space<vmem>>, %arg15: memref<1x1x32xf32, #tpu.memory_space<vmem>>, %arg16: memref<2x8x32xf32, #tpu.memory_space<vmem>>, %arg17: memref<16x32xf32, #tpu.memory_space<vmem>>) attributes {dimension_semantics = [#tpu.dimension_semantics<arbitrary>], iteration_bounds = array<i64: 2>, scalar_prefetch = 0 : i64, scratch_operands = 1 : i64, tpu.core_type = #tpu.core_type<tc>, window_params = [{pipeline_mode = #tpu.pipeline_mode<synchronous>, transform_indices = @transform_0, window_bounds = array<i64: 2, 8, 32>}, {pipeline_mode = #tpu.pipeline_mode<synchronous>, transform_indices = @transform_1, window_bounds = array<i64: 8, 32>}, {pipeline_mode = #tpu.pipeline_mode<synchronous>, transform_indices = @transform_2, window_bounds = array<i64: 2, 8, 32>}, {transform_indices = @transform_3, window_bounds = array<i64: 1, 12, 32, 8>}, {transform_indices = @transform_4, window_bounds = array<i64: 1, 12, 1, 8>}, {transform_indices = @transform_5, window_bounds = array<i64: 1, 4, 8, 32>}, {transform_indices = @transform_6, window_bounds = array<i64: 1, 1, 32>}, {transform_indices = @transform_7, window_bounds = array<i64: 1, 1, 32>}, {transform_indices = @transform_8, window_bounds = array<i64: 1, 1, 32>}, {transform_indices = @transform_9, window_bounds = array<i64: 1, 32, 64>}, {transform_indices = @transform_10, window_bounds = array<i64: 1, 1, 64>}, {transform_indices = @transform_11, window_bounds = array<i64: 1, 64, 32>}, {transform_indices = @transform_12, window_bounds = array<i64: 1, 1, 32>}, {transform_indices = @transform_13, window_bounds = array<i64: 1, 1, 32>}, {transform_indices = @transform_14, window_bounds = array<i64: 1, 1, 32>}, {pipeline_mode = #tpu.pipeline_mode<synchronous>, transform_indices = @transform_15, window_bounds = array<i64: 2, 8, 32>}]} {
    %c0_i32 = arith.constant 0 : i32
    %0 = arith.cmpi eq, %arg0, %c0_i32 : i32
    %1 = arith.extui %0 : i1 to i32
    %c0_i32_0 = arith.constant 0 : i32
    %2 = arith.cmpi ne, %1, %c0_i32_0 : i32
    scf.if %2 {
      %c0_182 = arith.constant 0 : index
      %c0_183 = arith.constant 0 : index
      %c0_184 = arith.constant 0 : index
      %278 = vector.load %arg1[%c0_182, %c0_183, %c0_184] : memref<2x8x32xf32, #tpu.memory_space<vmem>>, vector<2x8x32xf32>
      %cst_185 = arith.constant 5.65685415 : f32
      %279 = vector.broadcast %cst_185 : f32 to vector<2x8x32xf32>
      %280 = arith.mulf %278, %279 : vector<2x8x32xf32>
      %c0_186 = arith.constant 0 : index
      %c0_187 = arith.constant 0 : index
      %281 = vector.load %arg2[%c0_186, %c0_187] : memref<8x32xf32, #tpu.memory_space<vmem>>, vector<8x32xf32>
      %282 = vector.shape_cast %281 : vector<8x32xf32> to vector<1x8x32xf32>
      %283 = vector.broadcast %282 : vector<1x8x32xf32> to vector<2x8x32xf32>
      %284 = arith.addf %280, %283 : vector<2x8x32xf32>
      %c0_188 = arith.constant 0 : index
      %c0_189 = arith.constant 0 : index
      %c0_190 = arith.constant 0 : index
      %285 = vector.load %arg3[%c0_188, %c0_189, %c0_190] : memref<2x8x32xf32, #tpu.memory_space<vmem>>, vector<2x8x32xf32>
      %286 = arith.addf %284, %285 : vector<2x8x32xf32>
      %287 = vector.shape_cast %286 : vector<2x8x32xf32> to vector<16x32xf32>
      %c0_191 = arith.constant 0 : index
      %c0_192 = arith.constant 0 : index
      %288 = vector.load %arg17[%c0_191, %c0_192] : memref<16x32xf32, #tpu.memory_space<vmem>>, vector<16x32xf32>
      tpu.vector_store %arg17[%c0_191, %c0_192], %287 {strides = array<i32>} : memref<16x32xf32, #tpu.memory_space<vmem>>, vector<16x32xf32>,
    } else {
    }
    %c0 = arith.constant 0 : index
    %c0_1 = arith.constant 0 : index
    %3 = vector.load %arg17[%c0, %c0_1] : memref<16x32xf32, #tpu.memory_space<vmem>>, vector<16x32xf32>
    %4 = arith.truncf %3 : vector<16x32xf32> to vector<16x32xbf16>
    %cst = arith.constant 0.000000e+00 : f32
    %5 = vector.broadcast %cst : f32 to vector<16x32xf32>
    %c0_2 = arith.constant 0 : index
    %c0_3 = arith.constant 0 : index
    %c0_4 = arith.constant 0 : index
    %c0_5 = arith.constant 0 : index
    %6 = vector.load %arg4[%c0_2, %c0_3, %c0_4, %c0_5] : memref<1x12x32x8xbf16, #tpu.memory_space<vmem>>, vector<1x1x32x8xbf16>
    %7 = vector.shape_cast %6 : vector<1x1x32x8xbf16> to vector<32x8xbf16>
    %cst_6 = arith.constant dense<0.000000e+00> : vector<16x8xf32>
    %8 = tpu.matmul %4, %7, %cst_6 {dimension_numbers = #tpu.dot_dimension_numbers<[1], [0], [0], [1], [0, 0, 1, 1], [], []>} : vector<16x32xbf16>, vector<32x8xbf16>, vector<16x8xf32> -> vector<16x8xf32>
    %c0_7 = arith.constant 0 : index
    %c0_8 = arith.constant 0 : index
    %c0_9 = arith.constant 0 : index
    %c0_10 = arith.constant 0 : index
    %9 = vector.load %arg5[%c0_7, %c0_8, %c0_9, %c0_10] : memref<1x12x1x8xf32, #tpu.memory_space<vmem>>, vector<1x1x1x8xf32>
    %10 = vector.shape_cast %9 : vector<1x1x1x8xf32> to vector<1x8xf32>
    %11 = vector.broadcast %10 : vector<1x8xf32> to vector<16x8xf32>
    %12 = arith.addf %8, %11 : vector<16x8xf32>
    %c0_11 = arith.constant 0 : index
    %c4 = arith.constant 4 : index
    %c0_12 = arith.constant 0 : index
    %c0_13 = arith.constant 0 : index
    %13 = vector.load %arg4[%c0_11, %c4, %c0_12, %c0_13] : memref<1x12x32x8xbf16, #tpu.memory_space<vmem>>, vector<1x1x32x8xbf16>
    %14 = vector.shape_cast %13 : vector<1x1x32x8xbf16> to vector<32x8xbf16>
    %cst_14 = arith.constant dense<0.000000e+00> : vector<16x8xf32>
    %15 = tpu.matmul %4, %14, %cst_14 {dimension_numbers = #tpu.dot_dimension_numbers<[1], [0], [0], [1], [0, 0, 1, 1], [], []>} : vector<16x32xbf16>, vector<32x8xbf16>, vector<16x8xf32> -> vector<16x8xf32>
    %c0_15 = arith.constant 0 : index
    %c4_16 = arith.constant 4 : index
    %c0_17 = arith.constant 0 : index
    %c0_18 = arith.constant 0 : index
    %16 = vector.load %arg5[%c0_15, %c4_16, %c0_17, %c0_18] : memref<1x12x1x8xf32, #tpu.memory_space<vmem>>, vector<1x1x1x8xf32>
    %17 = vector.shape_cast %16 : vector<1x1x1x8xf32> to vector<1x8xf32>
    %18 = vector.broadcast %17 : vector<1x8xf32> to vector<16x8xf32>
    %19 = arith.addf %15, %18 : vector<16x8xf32>
    %c0_19 = arith.constant 0 : index
    %c8 = arith.constant 8 : index
    %c0_20 = arith.constant 0 : index
    %c0_21 = arith.constant 0 : index
    %20 = vector.load %arg4[%c0_19, %c8, %c0_20, %c0_21] : memref<1x12x32x8xbf16, #tpu.memory_space<vmem>>, vector<1x1x32x8xbf16>
    %21 = vector.shape_cast %20 : vector<1x1x32x8xbf16> to vector<32x8xbf16>
    %cst_22 = arith.constant dense<0.000000e+00> : vector<16x8xf32>
    %22 = tpu.matmul %4, %21, %cst_22 {dimension_numbers = #tpu.dot_dimension_numbers<[1], [0], [0], [1], [0, 0, 1, 1], [], []>} : vector<16x32xbf16>, vector<32x8xbf16>, vector<16x8xf32> -> vector<16x8xf32>
    %c0_23 = arith.constant 0 : index
    %c8_24 = arith.constant 8 : index
    %c0_25 = arith.constant 0 : index
    %c0_26 = arith.constant 0 : index
    %23 = vector.load %arg5[%c0_23, %c8_24, %c0_25, %c0_26] : memref<1x12x1x8xf32, #tpu.memory_space<vmem>>, vector<1x1x1x8xf32>
    %24 = vector.shape_cast %23 : vector<1x1x1x8xf32> to vector<1x8xf32>
    %25 = vector.broadcast %24 : vector<1x8xf32> to vector<16x8xf32>
    %26 = arith.addf %22, %25 : vector<16x8xf32>
    %27 = vector.shape_cast %12 : vector<16x8xf32> to vector<2x8x8xf32>
    %28 = vector.shape_cast %19 : vector<16x8xf32> to vector<2x8x8xf32>
    %29 = vector.shape_cast %26 : vector<16x8xf32> to vector<2x8x8xf32>
    %30 = arith.truncf %27 : vector<2x8x8xf32> to vector<2x8x8xbf16>
    %31 = arith.truncf %28 : vector<2x8x8xf32> to vector<2x8x8xbf16>
    "tpu.trace_start"() <{level = 10 : i32, message = "bqd,bkd->bqk"}> : () -> ()
    %cst_27 = arith.constant dense<0.000000e+00> : vector<2x8x8xf32>
    %32 = tpu.matmul %30, %31, %cst_27 {dimension_numbers = #tpu.dot_dimension_numbers<[2], [2], [1], [1], [0, 0, 0, 1, 1, 1], [0], [0]>} : vector<2x8x8xbf16>, vector<2x8x8xbf16>, vector<2x8x8xf32> -> vector<2x8x8xf32>
    "tpu.trace_stop"() : () -> ()
    %cst_28 = arith.constant 0.353553385 : f32
    %33 = vector.broadcast %cst_28 : f32 to vector<2x8x8xf32>
    %34 = arith.mulf %32, %33 : vector<2x8x8xf32>
    %cst_29 = arith.constant dense<0xFF800000> : vector<2x8xf32>
    %35 = vector.multi_reduction <maximumf>, %34, %cst_29 [2] : vector<2x8x8xf32> to vector<2x8xf32>
    %36 = vector.shape_cast %35 : vector<2x8xf32> to vector<2x8x1xf32>
    %37 = vector.broadcast %36 : vector<2x8x1xf32> to vector<2x8x8xf32>
    %38 = arith.subf %34, %37 : vector<2x8x8xf32>
    %39 = math.exp %38 : vector<2x8x8xf32>
    %cst_30 = arith.constant dense<0.000000e+00> : vector<2x8xf32>
    %40 = vector.multi_reduction <add>, %39, %cst_30 [2] : vector<2x8x8xf32> to vector<2x8xf32>
    %41 = vector.shape_cast %40 : vector<2x8xf32> to vector<2x8x1xf32>
    %42 = tpu.reciprocal %41 {approx = true} : vector<2x8x1xf32> -> vector<2x8x1xf32>
    %43 = vector.broadcast %42 : vector<2x8x1xf32> to vector<2x8x8xf32>
    %44 = arith.mulf %39, %43 : vector<2x8x8xf32>
    %45 = arith.truncf %44 : vector<2x8x8xf32> to vector<2x8x8xbf16>
    %46 = arith.truncf %29 : vector<2x8x8xf32> to vector<2x8x8xbf16>
    "tpu.trace_start"() <{level = 10 : i32, message = "bqk,bkd->bqd"}> : () -> ()
    %cst_31 = arith.constant dense<0.000000e+00> : vector<2x8x8xf32>
    %47 = tpu.matmul %45, %46, %cst_31 {dimension_numbers = #tpu.dot_dimension_numbers<[2], [1], [1], [2], [0, 0, 0, 1, 1, 2], [0], [0]>} : vector<2x8x8xbf16>, vector<2x8x8xbf16>, vector<2x8x8xf32> -> vector<2x8x8xf32>
    "tpu.trace_stop"() : () -> ()
    %48 = vector.shape_cast %47 : vector<2x8x8xf32> to vector<16x8xf32>
    %49 = arith.truncf %48 : vector<16x8xf32> to vector<16x8xbf16>
    %c0_32 = arith.constant 0 : index
    %c0_33 = arith.constant 0 : index
    %c0_34 = arith.constant 0 : index
    %c0_35 = arith.constant 0 : index
    %50 = vector.load %arg6[%c0_32, %c0_33, %c0_34, %c0_35] : memref<1x4x8x32xbf16, #tpu.memory_space<vmem>>, vector<1x1x8x32xbf16>
    %51 = vector.shape_cast %50 : vector<1x1x8x32xbf16> to vector<8x32xbf16>
    %cst_36 = arith.constant dense<0.000000e+00> : vector<16x32xf32>
    %52 = tpu.matmul %49, %51, %cst_36 {dimension_numbers = #tpu.dot_dimension_numbers<[1], [0], [0], [1], [0, 0, 1, 1], [], []>} : vector<16x8xbf16>, vector<8x32xbf16>, vector<16x32xf32> -> vector<16x32xf32>
    %53 = arith.addf %5, %52 : vector<16x32xf32>
    %c0_37 = arith.constant 0 : index
    %c1 = arith.constant 1 : index
    %c0_38 = arith.constant 0 : index
    %c0_39 = arith.constant 0 : index
    %54 = vector.load %arg4[%c0_37, %c1, %c0_38, %c0_39] : memref<1x12x32x8xbf16, #tpu.memory_space<vmem>>, vector<1x1x32x8xbf16>
    %55 = vector.shape_cast %54 : vector<1x1x32x8xbf16> to vector<32x8xbf16>
    %cst_40 = arith.constant dense<0.000000e+00> : vector<16x8xf32>
    %56 = tpu.matmul %4, %55, %cst_40 {dimension_numbers = #tpu.dot_dimension_numbers<[1], [0], [0], [1], [0, 0, 1, 1], [], []>} : vector<16x32xbf16>, vector<32x8xbf16>, vector<16x8xf32> -> vector<16x8xf32>
    %c0_41 = arith.constant 0 : index
    %c1_42 = arith.constant 1 : index
    %c0_43 = arith.constant 0 : index
    %c0_44 = arith.constant 0 : index
    %57 = vector.load %arg5[%c0_41, %c1_42, %c0_43, %c0_44] : memref<1x12x1x8xf32, #tpu.memory_space<vmem>>, vector<1x1x1x8xf32>
    %58 = vector.shape_cast %57 : vector<1x1x1x8xf32> to vector<1x8xf32>
    %59 = vector.broadcast %58 : vector<1x8xf32> to vector<16x8xf32>
    %60 = arith.addf %56, %59 : vector<16x8xf32>
    %c0_45 = arith.constant 0 : index
    %c5 = arith.constant 5 : index
    %c0_46 = arith.constant 0 : index
    %c0_47 = arith.constant 0 : index
    %61 = vector.load %arg4[%c0_45, %c5, %c0_46, %c0_47] : memref<1x12x32x8xbf16, #tpu.memory_space<vmem>>, vector<1x1x32x8xbf16>
    %62 = vector.shape_cast %61 : vector<1x1x32x8xbf16> to vector<32x8xbf16>
    %cst_48 = arith.constant dense<0.000000e+00> : vector<16x8xf32>
    %63 = tpu.matmul %4, %62, %cst_48 {dimension_numbers = #tpu.dot_dimension_numbers<[1], [0], [0], [1], [0, 0, 1, 1], [], []>} : vector<16x32xbf16>, vector<32x8xbf16>, vector<16x8xf32> -> vector<16x8xf32>
    %c0_49 = arith.constant 0 : index
    %c5_50 = arith.constant 5 : index
    %c0_51 = arith.constant 0 : index
    %c0_52 = arith.constant 0 : index
    %64 = vector.load %arg5[%c0_49, %c5_50, %c0_51, %c0_52] : memref<1x12x1x8xf32, #tpu.memory_space<vmem>>, vector<1x1x1x8xf32>
    %65 = vector.shape_cast %64 : vector<1x1x1x8xf32> to vector<1x8xf32>
    %66 = vector.broadcast %65 : vector<1x8xf32> to vector<16x8xf32>
    %67 = arith.addf %63, %66 : vector<16x8xf32>
    %c0_53 = arith.constant 0 : index
    %c9 = arith.constant 9 : index
    %c0_54 = arith.constant 0 : index
    %c0_55 = arith.constant 0 : index
    %68 = vector.load %arg4[%c0_53, %c9, %c0_54, %c0_55] : memref<1x12x32x8xbf16, #tpu.memory_space<vmem>>, vector<1x1x32x8xbf16>
    %69 = vector.shape_cast %68 : vector<1x1x32x8xbf16> to vector<32x8xbf16>
    %cst_56 = arith.constant dense<0.000000e+00> : vector<16x8xf32>
    %70 = tpu.matmul %4, %69, %cst_56 {dimension_numbers = #tpu.dot_dimension_numbers<[1], [0], [0], [1], [0, 0, 1, 1], [], []>} : vector<16x32xbf16>, vector<32x8xbf16>, vector<16x8xf32> -> vector<16x8xf32>
    %c0_57 = arith.constant 0 : index
    %c9_58 = arith.constant 9 : index
    %c0_59 = arith.constant 0 : index
    %c0_60 = arith.constant 0 : index
    %71 = vector.load %arg5[%c0_57, %c9_58, %c0_59, %c0_60] : memref<1x12x1x8xf32, #tpu.memory_space<vmem>>, vector<1x1x1x8xf32>
    %72 = vector.shape_cast %71 : vector<1x1x1x8xf32> to vector<1x8xf32>
    %73 = vector.broadcast %72 : vector<1x8xf32> to vector<16x8xf32>
    %74 = arith.addf %70, %73 : vector<16x8xf32>
    %75 = vector.shape_cast %60 : vector<16x8xf32> to vector<2x8x8xf32>
    %76 = vector.shape_cast %67 : vector<16x8xf32> to vector<2x8x8xf32>
    %77 = vector.shape_cast %74 : vector<16x8xf32> to vector<2x8x8xf32>
    %78 = arith.truncf %75 : vector<2x8x8xf32> to vector<2x8x8xbf16>
    %79 = arith.truncf %76 : vector<2x8x8xf32> to vector<2x8x8xbf16>
    "tpu.trace_start"() <{level = 10 : i32, message = "bqd,bkd->bqk"}> : () -> ()
    %cst_61 = arith.constant dense<0.000000e+00> : vector<2x8x8xf32>
    %80 = tpu.matmul %78, %79, %cst_61 {dimension_numbers = #tpu.dot_dimension_numbers<[2], [2], [1], [1], [0, 0, 0, 1, 1, 1], [0], [0]>} : vector<2x8x8xbf16>, vector<2x8x8xbf16>, vector<2x8x8xf32> -> vector<2x8x8xf32>
    "tpu.trace_stop"() : () -> ()
    %cst_62 = arith.constant 0.353553385 : f32
    %81 = vector.broadcast %cst_62 : f32 to vector<2x8x8xf32>
    %82 = arith.mulf %80, %81 : vector<2x8x8xf32>
    %cst_63 = arith.constant dense<0xFF800000> : vector<2x8xf32>
    %83 = vector.multi_reduction <maximumf>, %82, %cst_63 [2] : vector<2x8x8xf32> to vector<2x8xf32>
    %84 = vector.shape_cast %83 : vector<2x8xf32> to vector<2x8x1xf32>
    %85 = vector.broadcast %84 : vector<2x8x1xf32> to vector<2x8x8xf32>
    %86 = arith.subf %82, %85 : vector<2x8x8xf32>
    %87 = math.exp %86 : vector<2x8x8xf32>
    %cst_64 = arith.constant dense<0.000000e+00> : vector<2x8xf32>
    %88 = vector.multi_reduction <add>, %87, %cst_64 [2] : vector<2x8x8xf32> to vector<2x8xf32>
    %89 = vector.shape_cast %88 : vector<2x8xf32> to vector<2x8x1xf32>
    %90 = tpu.reciprocal %89 {approx = true} : vector<2x8x1xf32> -> vector<2x8x1xf32>
    %91 = vector.broadcast %90 : vector<2x8x1xf32> to vector<2x8x8xf32>
    %92 = arith.mulf %87, %91 : vector<2x8x8xf32>
    %93 = arith.truncf %92 : vector<2x8x8xf32> to vector<2x8x8xbf16>
    %94 = arith.truncf %77 : vector<2x8x8xf32> to vector<2x8x8xbf16>
    "tpu.trace_start"() <{level = 10 : i32, message = "bqk,bkd->bqd"}> : () -> ()
    %cst_65 = arith.constant dense<0.000000e+00> : vector<2x8x8xf32>
    %95 = tpu.matmul %93, %94, %cst_65 {dimension_numbers = #tpu.dot_dimension_numbers<[2], [1], [1], [2], [0, 0, 0, 1, 1, 2], [0], [0]>} : vector<2x8x8xbf16>, vector<2x8x8xbf16>, vector<2x8x8xf32> -> vector<2x8x8xf32>
    "tpu.trace_stop"() : () -> ()
    %96 = vector.shape_cast %95 : vector<2x8x8xf32> to vector<16x8xf32>
    %97 = arith.truncf %96 : vector<16x8xf32> to vector<16x8xbf16>
    %c0_66 = arith.constant 0 : index
    %c1_67 = arith.constant 1 : index
    %c0_68 = arith.constant 0 : index
    %c0_69 = arith.constant 0 : index
    %98 = vector.load %arg6[%c0_66, %c1_67, %c0_68, %c0_69] : memref<1x4x8x32xbf16, #tpu.memory_space<vmem>>, vector<1x1x8x32xbf16>
    %99 = vector.shape_cast %98 : vector<1x1x8x32xbf16> to vector<8x32xbf16>
    %cst_70 = arith.constant dense<0.000000e+00> : vector<16x32xf32>
    %100 = tpu.matmul %97, %99, %cst_70 {dimension_numbers = #tpu.dot_dimension_numbers<[1], [0], [0], [1], [0, 0, 1, 1], [], []>} : vector<16x8xbf16>, vector<8x32xbf16>, vector<16x32xf32> -> vector<16x32xf32>
    %101 = arith.addf %53, %100 : vector<16x32xf32>
    %c0_71 = arith.constant 0 : index
    %c2 = arith.constant 2 : index
    %c0_72 = arith.constant 0 : index
    %c0_73 = arith.constant 0 : index
    %102 = vector.load %arg4[%c0_71, %c2, %c0_72, %c0_73] : memref<1x12x32x8xbf16, #tpu.memory_space<vmem>>, vector<1x1x32x8xbf16>
    %103 = vector.shape_cast %102 : vector<1x1x32x8xbf16> to vector<32x8xbf16>
    %cst_74 = arith.constant dense<0.000000e+00> : vector<16x8xf32>
    %104 = tpu.matmul %4, %103, %cst_74 {dimension_numbers = #tpu.dot_dimension_numbers<[1], [0], [0], [1], [0, 0, 1, 1], [], []>} : vector<16x32xbf16>, vector<32x8xbf16>, vector<16x8xf32> -> vector<16x8xf32>
    %c0_75 = arith.constant 0 : index
    %c2_76 = arith.constant 2 : index
    %c0_77 = arith.constant 0 : index
    %c0_78 = arith.constant 0 : index
    %105 = vector.load %arg5[%c0_75, %c2_76, %c0_77, %c0_78] : memref<1x12x1x8xf32, #tpu.memory_space<vmem>>, vector<1x1x1x8xf32>
    %106 = vector.shape_cast %105 : vector<1x1x1x8xf32> to vector<1x8xf32>
    %107 = vector.broadcast %106 : vector<1x8xf32> to vector<16x8xf32>
    %108 = arith.addf %104, %107 : vector<16x8xf32>
    %c0_79 = arith.constant 0 : index
    %c6 = arith.constant 6 : index
    %c0_80 = arith.constant 0 : index
    %c0_81 = arith.constant 0 : index
    %109 = vector.load %arg4[%c0_79, %c6, %c0_80, %c0_81] : memref<1x12x32x8xbf16, #tpu.memory_space<vmem>>, vector<1x1x32x8xbf16>
    %110 = vector.shape_cast %109 : vector<1x1x32x8xbf16> to vector<32x8xbf16>
    %cst_82 = arith.constant dense<0.000000e+00> : vector<16x8xf32>
    %111 = tpu.matmul %4, %110, %cst_82 {dimension_numbers = #tpu.dot_dimension_numbers<[1], [0], [0], [1], [0, 0, 1, 1], [], []>} : vector<16x32xbf16>, vector<32x8xbf16>, vector<16x8xf32> -> vector<16x8xf32>
    %c0_83 = arith.constant 0 : index
    %c6_84 = arith.constant 6 : index
    %c0_85 = arith.constant 0 : index
    %c0_86 = arith.constant 0 : index
    %112 = vector.load %arg5[%c0_83, %c6_84, %c0_85, %c0_86] : memref<1x12x1x8xf32, #tpu.memory_space<vmem>>, vector<1x1x1x8xf32>
    %113 = vector.shape_cast %112 : vector<1x1x1x8xf32> to vector<1x8xf32>
    %114 = vector.broadcast %113 : vector<1x8xf32> to vector<16x8xf32>
    %115 = arith.addf %111, %114 : vector<16x8xf32>
    %c0_87 = arith.constant 0 : index
    %c10 = arith.constant 10 : index
    %c0_88 = arith.constant 0 : index
    %c0_89 = arith.constant 0 : index
    %116 = vector.load %arg4[%c0_87, %c10, %c0_88, %c0_89] : memref<1x12x32x8xbf16, #tpu.memory_space<vmem>>, vector<1x1x32x8xbf16>
    %117 = vector.shape_cast %116 : vector<1x1x32x8xbf16> to vector<32x8xbf16>
    %cst_90 = arith.constant dense<0.000000e+00> : vector<16x8xf32>
    %118 = tpu.matmul %4, %117, %cst_90 {dimension_numbers = #tpu.dot_dimension_numbers<[1], [0], [0], [1], [0, 0, 1, 1], [], []>} : vector<16x32xbf16>, vector<32x8xbf16>, vector<16x8xf32> -> vector<16x8xf32>
    %c0_91 = arith.constant 0 : index
    %c10_92 = arith.constant 10 : index
    %c0_93 = arith.constant 0 : index
    %c0_94 = arith.constant 0 : index
    %119 = vector.load %arg5[%c0_91, %c10_92, %c0_93, %c0_94] : memref<1x12x1x8xf32, #tpu.memory_space<vmem>>, vector<1x1x1x8xf32>
    %120 = vector.shape_cast %119 : vector<1x1x1x8xf32> to vector<1x8xf32>
    %121 = vector.broadcast %120 : vector<1x8xf32> to vector<16x8xf32>
    %122 = arith.addf %118, %121 : vector<16x8xf32>
    %123 = vector.shape_cast %108 : vector<16x8xf32> to vector<2x8x8xf32>
    %124 = vector.shape_cast %115 : vector<16x8xf32> to vector<2x8x8xf32>
    %125 = vector.shape_cast %122 : vector<16x8xf32> to vector<2x8x8xf32>
    %126 = arith.truncf %123 : vector<2x8x8xf32> to vector<2x8x8xbf16>
    %127 = arith.truncf %124 : vector<2x8x8xf32> to vector<2x8x8xbf16>
    "tpu.trace_start"() <{level = 10 : i32, message = "bqd,bkd->bqk"}> : () -> ()
    %cst_95 = arith.constant dense<0.000000e+00> : vector<2x8x8xf32>
    %128 = tpu.matmul %126, %127, %cst_95 {dimension_numbers = #tpu.dot_dimension_numbers<[2], [2], [1], [1], [0, 0, 0, 1, 1, 1], [0], [0]>} : vector<2x8x8xbf16>, vector<2x8x8xbf16>, vector<2x8x8xf32> -> vector<2x8x8xf32>
    "tpu.trace_stop"() : () -> ()
    %cst_96 = arith.constant 0.353553385 : f32
    %129 = vector.broadcast %cst_96 : f32 to vector<2x8x8xf32>
    %130 = arith.mulf %128, %129 : vector<2x8x8xf32>
    %cst_97 = arith.constant dense<0xFF800000> : vector<2x8xf32>
    %131 = vector.multi_reduction <maximumf>, %130, %cst_97 [2] : vector<2x8x8xf32> to vector<2x8xf32>
    %132 = vector.shape_cast %131 : vector<2x8xf32> to vector<2x8x1xf32>
    %133 = vector.broadcast %132 : vector<2x8x1xf32> to vector<2x8x8xf32>
    %134 = arith.subf %130, %133 : vector<2x8x8xf32>
    %135 = math.exp %134 : vector<2x8x8xf32>
    %cst_98 = arith.constant dense<0.000000e+00> : vector<2x8xf32>
    %136 = vector.multi_reduction <add>, %135, %cst_98 [2] : vector<2x8x8xf32> to vector<2x8xf32>
    %137 = vector.shape_cast %136 : vector<2x8xf32> to vector<2x8x1xf32>
    %138 = tpu.reciprocal %137 {approx = true} : vector<2x8x1xf32> -> vector<2x8x1xf32>
    %139 = vector.broadcast %138 : vector<2x8x1xf32> to vector<2x8x8xf32>
    %140 = arith.mulf %135, %139 : vector<2x8x8xf32>
    %141 = arith.truncf %140 : vector<2x8x8xf32> to vector<2x8x8xbf16>
    %142 = arith.truncf %125 : vector<2x8x8xf32> to vector<2x8x8xbf16>
    "tpu.trace_start"() <{level = 10 : i32, message = "bqk,bkd->bqd"}> : () -> ()
    %cst_99 = arith.constant dense<0.000000e+00> : vector<2x8x8xf32>
    %143 = tpu.matmul %141, %142, %cst_99 {dimension_numbers = #tpu.dot_dimension_numbers<[2], [1], [1], [2], [0, 0, 0, 1, 1, 2], [0], [0]>} : vector<2x8x8xbf16>, vector<2x8x8xbf16>, vector<2x8x8xf32> -> vector<2x8x8xf32>
    "tpu.trace_stop"() : () -> ()
    %144 = vector.shape_cast %143 : vector<2x8x8xf32> to vector<16x8xf32>
    %145 = arith.truncf %144 : vector<16x8xf32> to vector<16x8xbf16>
    %c0_100 = arith.constant 0 : index
    %c2_101 = arith.constant 2 : index
    %c0_102 = arith.constant 0 : index
    %c0_103 = arith.constant 0 : index
    %146 = vector.load %arg6[%c0_100, %c2_101, %c0_102, %c0_103] : memref<1x4x8x32xbf16, #tpu.memory_space<vmem>>, vector<1x1x8x32xbf16>
    %147 = vector.shape_cast %146 : vector<1x1x8x32xbf16> to vector<8x32xbf16>
    %cst_104 = arith.constant dense<0.000000e+00> : vector<16x32xf32>
    %148 = tpu.matmul %145, %147, %cst_104 {dimension_numbers = #tpu.dot_dimension_numbers<[1], [0], [0], [1], [0, 0, 1, 1], [], []>} : vector<16x8xbf16>, vector<8x32xbf16>, vector<16x32xf32> -> vector<16x32xf32>
    %149 = arith.addf %101, %148 : vector<16x32xf32>
    %c0_105 = arith.constant 0 : index
    %c3 = arith.constant 3 : index
    %c0_106 = arith.constant 0 : index
    %c0_107 = arith.constant 0 : index
    %150 = vector.load %arg4[%c0_105, %c3, %c0_106, %c0_107] : memref<1x12x32x8xbf16, #tpu.memory_space<vmem>>, vector<1x1x32x8xbf16>
    %151 = vector.shape_cast %150 : vector<1x1x32x8xbf16> to vector<32x8xbf16>
    %cst_108 = arith.constant dense<0.000000e+00> : vector<16x8xf32>
    %152 = tpu.matmul %4, %151, %cst_108 {dimension_numbers = #tpu.dot_dimension_numbers<[1], [0], [0], [1], [0, 0, 1, 1], [], []>} : vector<16x32xbf16>, vector<32x8xbf16>, vector<16x8xf32> -> vector<16x8xf32>
    %c0_109 = arith.constant 0 : index
    %c3_110 = arith.constant 3 : index
    %c0_111 = arith.constant 0 : index
    %c0_112 = arith.constant 0 : index
    %153 = vector.load %arg5[%c0_109, %c3_110, %c0_111, %c0_112] : memref<1x12x1x8xf32, #tpu.memory_space<vmem>>, vector<1x1x1x8xf32>
    %154 = vector.shape_cast %153 : vector<1x1x1x8xf32> to vector<1x8xf32>
    %155 = vector.broadcast %154 : vector<1x8xf32> to vector<16x8xf32>
    %156 = arith.addf %152, %155 : vector<16x8xf32>
    %c0_113 = arith.constant 0 : index
    %c7 = arith.constant 7 : index
    %c0_114 = arith.constant 0 : index
    %c0_115 = arith.constant 0 : index
    %157 = vector.load %arg4[%c0_113, %c7, %c0_114, %c0_115] : memref<1x12x32x8xbf16, #tpu.memory_space<vmem>>, vector<1x1x32x8xbf16>
    %158 = vector.shape_cast %157 : vector<1x1x32x8xbf16> to vector<32x8xbf16>
    %cst_116 = arith.constant dense<0.000000e+00> : vector<16x8xf32>
    %159 = tpu.matmul %4, %158, %cst_116 {dimension_numbers = #tpu.dot_dimension_numbers<[1], [0], [0], [1], [0, 0, 1, 1], [], []>} : vector<16x32xbf16>, vector<32x8xbf16>, vector<16x8xf32> -> vector<16x8xf32>
    %c0_117 = arith.constant 0 : index
    %c7_118 = arith.constant 7 : index
    %c0_119 = arith.constant 0 : index
    %c0_120 = arith.constant 0 : index
    %160 = vector.load %arg5[%c0_117, %c7_118, %c0_119, %c0_120] : memref<1x12x1x8xf32, #tpu.memory_space<vmem>>, vector<1x1x1x8xf32>
    %161 = vector.shape_cast %160 : vector<1x1x1x8xf32> to vector<1x8xf32>
    %162 = vector.broadcast %161 : vector<1x8xf32> to vector<16x8xf32>
    %163 = arith.addf %159, %162 : vector<16x8xf32>
    %c0_121 = arith.constant 0 : index
    %c11 = arith.constant 11 : index
    %c0_122 = arith.constant 0 : index
    %c0_123 = arith.constant 0 : index
    %164 = vector.load %arg4[%c0_121, %c11, %c0_122, %c0_123] : memref<1x12x32x8xbf16, #tpu.memory_space<vmem>>, vector<1x1x32x8xbf16>
    %165 = vector.shape_cast %164 : vector<1x1x32x8xbf16> to vector<32x8xbf16>
    %cst_124 = arith.constant dense<0.000000e+00> : vector<16x8xf32>
    %166 = tpu.matmul %4, %165, %cst_124 {dimension_numbers = #tpu.dot_dimension_numbers<[1], [0], [0], [1], [0, 0, 1, 1], [], []>} : vector<16x32xbf16>, vector<32x8xbf16>, vector<16x8xf32> -> vector<16x8xf32>
    %c0_125 = arith.constant 0 : index
    %c11_126 = arith.constant 11 : index
    %c0_127 = arith.constant 0 : index
    %c0_128 = arith.constant 0 : index
    %167 = vector.load %arg5[%c0_125, %c11_126, %c0_127, %c0_128] : memref<1x12x1x8xf32, #tpu.memory_space<vmem>>, vector<1x1x1x8xf32>
    %168 = vector.shape_cast %167 : vector<1x1x1x8xf32> to vector<1x8xf32>
    %169 = vector.broadcast %168 : vector<1x8xf32> to vector<16x8xf32>
    %170 = arith.addf %166, %169 : vector<16x8xf32>
    %171 = vector.shape_cast %156 : vector<16x8xf32> to vector<2x8x8xf32>
    %172 = vector.shape_cast %163 : vector<16x8xf32> to vector<2x8x8xf32>
    %173 = vector.shape_cast %170 : vector<16x8xf32> to vector<2x8x8xf32>
    %174 = arith.truncf %171 : vector<2x8x8xf32> to vector<2x8x8xbf16>
    %175 = arith.truncf %172 : vector<2x8x8xf32> to vector<2x8x8xbf16>
    "tpu.trace_start"() <{level = 10 : i32, message = "bqd,bkd->bqk"}> : () -> ()
    %cst_129 = arith.constant dense<0.000000e+00> : vector<2x8x8xf32>
    %176 = tpu.matmul %174, %175, %cst_129 {dimension_numbers = #tpu.dot_dimension_numbers<[2], [2], [1], [1], [0, 0, 0, 1, 1, 1], [0], [0]>} : vector<2x8x8xbf16>, vector<2x8x8xbf16>, vector<2x8x8xf32> -> vector<2x8x8xf32>
    "tpu.trace_stop"() : () -> ()
    %cst_130 = arith.constant 0.353553385 : f32
    %177 = vector.broadcast %cst_130 : f32 to vector<2x8x8xf32>
    %178 = arith.mulf %176, %177 : vector<2x8x8xf32>
    %cst_131 = arith.constant dense<0xFF800000> : vector<2x8xf32>
    %179 = vector.multi_reduction <maximumf>, %178, %cst_131 [2] : vector<2x8x8xf32> to vector<2x8xf32>
    %180 = vector.shape_cast %179 : vector<2x8xf32> to vector<2x8x1xf32>
    %181 = vector.broadcast %180 : vector<2x8x1xf32> to vector<2x8x8xf32>
    %182 = arith.subf %178, %181 : vector<2x8x8xf32>
    %183 = math.exp %182 : vector<2x8x8xf32>
    %cst_132 = arith.constant dense<0.000000e+00> : vector<2x8xf32>
    %184 = vector.multi_reduction <add>, %183, %cst_132 [2] : vector<2x8x8xf32> to vector<2x8xf32>
    %185 = vector.shape_cast %184 : vector<2x8xf32> to vector<2x8x1xf32>
    %186 = tpu.reciprocal %185 {approx = true} : vector<2x8x1xf32> -> vector<2x8x1xf32>
    %187 = vector.broadcast %186 : vector<2x8x1xf32> to vector<2x8x8xf32>
    %188 = arith.mulf %183, %187 : vector<2x8x8xf32>
    %189 = arith.truncf %188 : vector<2x8x8xf32> to vector<2x8x8xbf16>
    %190 = arith.truncf %173 : vector<2x8x8xf32> to vector<2x8x8xbf16>
    "tpu.trace_start"() <{level = 10 : i32, message = "bqk,bkd->bqd"}> : () -> ()
    %cst_133 = arith.constant dense<0.000000e+00> : vector<2x8x8xf32>
    %191 = tpu.matmul %189, %190, %cst_133 {dimension_numbers = #tpu.dot_dimension_numbers<[2], [1], [1], [2], [0, 0, 0, 1, 1, 2], [0], [0]>} : vector<2x8x8xbf16>, vector<2x8x8xbf16>, vector<2x8x8xf32> -> vector<2x8x8xf32>
    "tpu.trace_stop"() : () -> ()
    %192 = vector.shape_cast %191 : vector<2x8x8xf32> to vector<16x8xf32>
    %193 = arith.truncf %192 : vector<16x8xf32> to vector<16x8xbf16>
    %c0_134 = arith.constant 0 : index
    %c3_135 = arith.constant 3 : index
    %c0_136 = arith.constant 0 : index
    %c0_137 = arith.constant 0 : index
    %194 = vector.load %arg6[%c0_134, %c3_135, %c0_136, %c0_137] : memref<1x4x8x32xbf16, #tpu.memory_space<vmem>>, vector<1x1x8x32xbf16>
    %195 = vector.shape_cast %194 : vector<1x1x8x32xbf16> to vector<8x32xbf16>
    %cst_138 = arith.constant dense<0.000000e+00> : vector<16x32xf32>
    %196 = tpu.matmul %193, %195, %cst_138 {dimension_numbers = #tpu.dot_dimension_numbers<[1], [0], [0], [1], [0, 0, 1, 1], [], []>} : vector<16x8xbf16>, vector<8x32xbf16>, vector<16x32xf32> -> vector<16x32xf32>
    %197 = arith.addf %149, %196 : vector<16x32xf32>
    %c0_139 = arith.constant 0 : index
    %c0_140 = arith.constant 0 : index
    %c0_141 = arith.constant 0 : index
    %198 = vector.load %arg7[%c0_139, %c0_140, %c0_141] : memref<1x1x32xf32, #tpu.memory_space<vmem>>, vector<1x1x32xf32>
    %199 = vector.shape_cast %198 : vector<1x1x32xf32> to vector<1x32xf32>
    %200 = vector.broadcast %199 : vector<1x32xf32> to vector<16x32xf32>
    %201 = arith.addf %197, %200 : vector<16x32xf32>
    %202 = arith.addf %3, %201 : vector<16x32xf32>
    %c0_142 = arith.constant 0 : index
    %c0_143 = arith.constant 0 : index
    %c0_144 = arith.constant 0 : index
    %203 = vector.load %arg8[%c0_142, %c0_143, %c0_144] : memref<1x1x32xf32, #tpu.memory_space<vmem>>, vector<1x1x32xf32>
    %204 = vector.shape_cast %203 : vector<1x1x32xf32> to vector<1x32xf32>
    %c0_145 = arith.constant 0 : index
    %c0_146 = arith.constant 0 : index
    %c0_147 = arith.constant 0 : index
    %205 = vector.load %arg9[%c0_145, %c0_146, %c0_147] : memref<1x1x32xf32, #tpu.memory_space<vmem>>, vector<1x1x32xf32>
    %206 = vector.shape_cast %205 : vector<1x1x32xf32> to vector<1x32xf32>
    %cst_148 = arith.constant dense<0.000000e+00> : vector<16xf32>
    %207 = vector.multi_reduction <add>, %202, %cst_148 [1] : vector<16x32xf32> to vector<16xf32>
    %208 = vector.shape_cast %207 : vector<16xf32> to vector<16x1xf32>
    %cst_149 = arith.constant 3.200000e+01 : f32
    %209 = vector.broadcast %cst_149 : f32 to vector<16x1xf32>
    %210 = arith.divf %208, %209 : vector<16x1xf32>
    %211 = vector.broadcast %210 : vector<16x1xf32> to vector<16x32xf32>
    %212 = arith.subf %202, %211 : vector<16x32xf32>
    %213 = arith.mulf %212, %212 : vector<16x32xf32>
    %cst_150 = arith.constant dense<0.000000e+00> : vector<16xf32>
    %214 = vector.multi_reduction <add>, %213, %cst_150 [1] : vector<16x32xf32> to vector<16xf32>
    %215 = vector.shape_cast %214 : vector<16xf32> to vector<16x1xf32>
    %cst_151 = arith.constant 3.200000e+01 : f32
    %216 = vector.broadcast %cst_151 : f32 to vector<16x1xf32>
    %217 = arith.divf %215, %216 : vector<16x1xf32>
    %218 = vector.broadcast %210 : vector<16x1xf32> to vector<16x32xf32>
    %219 = arith.subf %202, %218 : vector<16x32xf32>
    %cst_152 = arith.constant 9.99999974E-6 : f32
    %220 = vector.broadcast %cst_152 : f32 to vector<16x1xf32>
    %221 = arith.addf %217, %220 : vector<16x1xf32>
    %222 = math.rsqrt %221 : vector<16x1xf32>
    %223 = vector.broadcast %222 : vector<16x1xf32> to vector<16x32xf32>
    %224 = arith.mulf %219, %223 : vector<16x32xf32>
    %225 = vector.broadcast %204 : vector<1x32xf32> to vector<16x32xf32>
    %226 = arith.mulf %224, %225 : vector<16x32xf32>
    %227 = vector.broadcast %206 : vector<1x32xf32> to vector<16x32xf32>
    %228 = arith.addf %226, %227 : vector<16x32xf32>
    %229 = arith.truncf %228 : vector<16x32xf32> to vector<16x32xbf16>
    %c0_153 = arith.constant 0 : index
    %c0_154 = arith.constant 0 : index
    %c0_155 = arith.constant 0 : index
    %230 = vector.load %arg10[%c0_153, %c0_154, %c0_155] : memref<1x32x64xbf16, #tpu.memory_space<vmem>>, vector<1x32x64xbf16>
    %231 = vector.shape_cast %230 : vector<1x32x64xbf16> to vector<32x64xbf16>
    %cst_156 = arith.constant dense<0.000000e+00> : vector<16x64xf32>
    %232 = tpu.matmul %229, %231, %cst_156 {dimension_numbers = #tpu.dot_dimension_numbers<[1], [0], [0], [1], [0, 0, 1, 1], [], []>} : vector<16x32xbf16>, vector<32x64xbf16>, vector<16x64xf32> -> vector<16x64xf32>
    %c0_157 = arith.constant 0 : index
    %c0_158 = arith.constant 0 : index
    %c0_159 = arith.constant 0 : index
    %233 = vector.load %arg11[%c0_157, %c0_158, %c0_159] : memref<1x1x64xf32, #tpu.memory_space<vmem>>, vector<1x1x64xf32>
    %234 = vector.shape_cast %233 : vector<1x1x64xf32> to vector<1x64xf32>
    %235 = vector.broadcast %234 : vector<1x64xf32> to vector<16x64xf32>
    %236 = arith.addf %232, %235 : vector<16x64xf32>
    %cst_160 = arith.constant 0.000000e+00 : f32
    %237 = vector.broadcast %cst_160 : f32 to vector<16x64xf32>
    %238 = arith.maximumf %236, %237 : vector<16x64xf32>
    %239 = arith.truncf %238 : vector<16x64xf32> to vector<16x64xbf16>
    %c0_161 = arith.constant 0 : index
    %c0_162 = arith.constant 0 : index
    %c0_163 = arith.constant 0 : index
    %240 = vector.load %arg12[%c0_161, %c0_162, %c0_163] : memref<1x64x32xbf16, #tpu.memory_space<vmem>>, vector<1x64x32xbf16>
    %241 = vector.shape_cast %240 : vector<1x64x32xbf16> to vector<64x32xbf16>
    %cst_164 = arith.constant dense<0.000000e+00> : vector<16x32xf32>
    %242 = tpu.matmul %239, %241, %cst_164 {dimension_numbers = #tpu.dot_dimension_numbers<[1], [0], [0], [1], [0, 0, 1, 1], [], []>} : vector<16x64xbf16>, vector<64x32xbf16>, vector<16x32xf32> -> vector<16x32xf32>
    %c0_165 = arith.constant 0 : index
    %c0_166 = arith.constant 0 : index
    %c0_167 = arith.constant 0 : index
    %243 = vector.load %arg13[%c0_165, %c0_166, %c0_167] : memref<1x1x32xf32, #tpu.memory_space<vmem>>, vector<1x1x32xf32>
    %244 = vector.shape_cast %243 : vector<1x1x32xf32> to vector<1x32xf32>
    %245 = vector.broadcast %244 : vector<1x32xf32> to vector<16x32xf32>
    %246 = arith.addf %242, %245 : vector<16x32xf32>
    %247 = arith.addf %228, %246 : vector<16x32xf32>
    %c0_168 = arith.constant 0 : index
    %c0_169 = arith.constant 0 : index
    %c0_170 = arith.constant 0 : index
    %248 = vector.load %arg14[%c0_168, %c0_169, %c0_170] : memref<1x1x32xf32, #tpu.memory_space<vmem>>, vector<1x1x32xf32>
    %249 = vector.shape_cast %248 : vector<1x1x32xf32> to vector<1x32xf32>
    %c0_171 = arith.constant 0 : index
    %c0_172 = arith.constant 0 : index
    %c0_173 = arith.constant 0 : index
    %250 = vector.load %arg15[%c0_171, %c0_172, %c0_173] : memref<1x1x32xf32, #tpu.memory_space<vmem>>, vector<1x1x32xf32>
    %251 = vector.shape_cast %250 : vector<1x1x32xf32> to vector<1x32xf32>
    %cst_174 = arith.constant dense<0.000000e+00> : vector<16xf32>
    %252 = vector.multi_reduction <add>, %247, %cst_174 [1] : vector<16x32xf32> to vector<16xf32>
    %253 = vector.shape_cast %252 : vector<16xf32> to vector<16x1xf32>
    %cst_175 = arith.constant 3.200000e+01 : f32
    %254 = vector.broadcast %cst_175 : f32 to vector<16x1xf32>
    %255 = arith.divf %253, %254 : vector<16x1xf32>
    %256 = vector.broadcast %255 : vector<16x1xf32> to vector<16x32xf32>
    %257 = arith.subf %247, %256 : vector<16x32xf32>
    %258 = arith.mulf %257, %257 : vector<16x32xf32>
    %cst_176 = arith.constant dense<0.000000e+00> : vector<16xf32>
    %259 = vector.multi_reduction <add>, %258, %cst_176 [1] : vector<16x32xf32> to vector<16xf32>
    %260 = vector.shape_cast %259 : vector<16xf32> to vector<16x1xf32>
    %cst_177 = arith.constant 3.200000e+01 : f32
    %261 = vector.broadcast %cst_177 : f32 to vector<16x1xf32>
    %262 = arith.divf %260, %261 : vector<16x1xf32>
    %263 = vector.broadcast %255 : vector<16x1xf32> to vector<16x32xf32>
    %264 = arith.subf %247, %263 : vector<16x32xf32>
    %cst_178 = arith.constant 9.99999974E-6 : f32
    %265 = vector.broadcast %cst_178 : f32 to vector<16x1xf32>
    %266 = arith.addf %262, %265 : vector<16x1xf32>
    %267 = math.rsqrt %266 : vector<16x1xf32>
    %268 = vector.broadcast %267 : vector<16x1xf32> to vector<16x32xf32>
    %269 = arith.mulf %264, %268 : vector<16x32xf32>
    %270 = vector.broadcast %249 : vector<1x32xf32> to vector<16x32xf32>
    %271 = arith.mulf %269, %270 : vector<16x32xf32>
    %272 = vector.broadcast %251 : vector<1x32xf32> to vector<16x32xf32>
    %273 = arith.addf %271, %272 : vector<16x32xf32>
    %c0_179 = arith.constant 0 : index
    %c0_180 = arith.constant 0 : index
    %274 = vector.load %arg17[%c0_179, %c0_180] : memref<16x32xf32, #tpu.memory_space<vmem>>, vector<16x32xf32>
    tpu.vector_store %arg17[%c0_179, %c0_180], %273 {strides = array<i32>} : memref<16x32xf32, #tpu.memory_space<vmem>>, vector<16x32xf32>,
    %c1_i32 = arith.constant 1 : i32
    %275 = arith.cmpi eq, %arg0, %c1_i32 : i32
    %276 = arith.extui %275 : i1 to i32
    %c0_i32_181 = arith.constant 0 : i32
    %277 = arith.cmpi ne, %276, %c0_i32_181 : i32
    scf.if %277 {
      %278 = vector.shape_cast %273 : vector<16x32xf32> to vector<2x8x32xf32>
      %c0_182 = arith.constant 0 : index
      %c0_183 = arith.constant 0 : index
      %c0_184 = arith.constant 0 : index
      %279 = vector.load %arg16[%c0_182, %c0_183, %c0_184] : memref<2x8x32xf32, #tpu.memory_space<vmem>>, vector<2x8x32xf32>
      tpu.vector_store %arg16[%c0_182, %c0_183, %c0_184], %278 {strides = array<i32>} : memref<2x8x32xf32, #tpu.memory_space<vmem>>, vector<2x8x32xf32>,
    } else {
    }
    return
  }
  func.func @transform_0(%arg0: i32) -> (i32, i32, i32) {
    %c0_i32 = arith.constant 0 : i32
    %c0_i32_0 = arith.constant 0 : i32
    %c0_i32_1 = arith.constant 0 : i32
    %c0_i32_2 = arith.constant 0 : i32
    return %c0_i32, %c0_i32_0, %c0_i32_1 : i32, i32, i32
  }
  func.func @transform_1(%arg0: i32) -> (i32, i32) {
    %c0_i32 = arith.constant 0 : i32
    %c0_i32_0 = arith.constant 0 : i32
    %c0_i32_1 = arith.constant 0 : i32
    return %c0_i32, %c0_i32_0 : i32, i32
  }
  func.func @transform_2(%arg0: i32) -> (i32, i32, i32) {
    %c0_i32 = arith.constant 0 : i32
    %c0_i32_0 = arith.constant 0 : i32
    %c0_i32_1 = arith.constant 0 : i32
    %c0_i32_2 = arith.constant 0 : i32
    return %c0_i32, %c0_i32_0, %c0_i32_1 : i32, i32, i32
  }
  func.func @transform_3(%arg0: i32) -> (i32, i32, i32, i32) {
    %c0_i32 = arith.constant 0 : i32
    %c0_i32_0 = arith.constant 0 : i32
    %c0_i32_1 = arith.constant 0 : i32
    %c0_i32_2 = arith.constant 0 : i32
    return %arg0, %c0_i32, %c0_i32_0, %c0_i32_1 : i32, i32, i32, i32
  }
  func.func @transform_4(%arg0: i32) -> (i32, i32, i32, i32) {
    %c0_i32 = arith.constant 0 : i32
    %c0_i32_0 = arith.constant 0 : i32
    %c0_i32_1 = arith.constant 0 : i32
    %c0_i32_2 = arith.constant 0 : i32
    return %arg0, %c0_i32, %c0_i32_0, %c0_i32_1 : i32, i32, i32, i32
  }
  func.func @transform_5(%arg0: i32) -> (i32, i32, i32, i32) {
    %c0_i32 = arith.constant 0 : i32
    %c0_i32_0 = arith.constant 0 : i32
    %c0_i32_1 = arith.constant 0 : i32
    %c0_i32_2 = arith.constant 0 : i32
    return %arg0, %c0_i32, %c0_i32_0, %c0_i32_1 : i32, i32, i32, i32
  }
  func.func @transform_6(%arg0: i32) -> (i32, i32, i32) {
    %c0_i32 = arith.constant 0 : i32
    %c0_i32_0 = arith.constant 0 : i32
    %c0_i32_1 = arith.constant 0 : i32
    return %arg0, %c0_i32, %c0_i32_0 : i32, i32, i32
  }
  func.func @transform_7(%arg0: i32) -> (i32, i32, i32) {
    %c0_i32 = arith.constant 0 : i32
    %c0_i32_0 = arith.constant 0 : i32
    %c0_i32_1 = arith.constant 0 : i32
    return %arg0, %c0_i32, %c0_i32_0 : i32, i32, i32
  }
  func.func @transform_8(%arg0: i32) -> (i32, i32, i32) {
    %c0_i32 = arith.constant 0 : i32
    %c0_i32_0 = arith.constant 0 : i32
    %c0_i32_1 = arith.constant 0 : i32
    return %arg0, %c0_i32, %c0_i32_0 : i32, i32, i32
  }
  func.func @transform_9(%arg0: i32) -> (i32, i32, i32) {
    %c0_i32 = arith.constant 0 : i32
    %c0_i32_0 = arith.constant 0 : i32
    %c0_i32_1 = arith.constant 0 : i32
    return %arg0, %c0_i32, %c0_i32_0 : i32, i32, i32
  }
  func.func @transform_10(%arg0: i32) -> (i32, i32, i32) {
    %c0_i32 = arith.constant 0 : i32
    %c0_i32_0 = arith.constant 0 : i32
    %c0_i32_1 = arith.constant 0 : i32
    return %arg0, %c0_i32, %c0_i32_0 : i32, i32, i32
  }
  func.func @transform_11(%arg0: i32) -> (i32, i32, i32) {
    %c0_i32 = arith.constant 0 : i32
    %c0_i32_0 = arith.constant 0 : i32
    %c0_i32_1 = arith.constant 0 : i32
    return %arg0, %c0_i32, %c0_i32_0 : i32, i32, i32
  }
  func.func @transform_12(%arg0: i32) -> (i32, i32, i32) {
    %c0_i32 = arith.constant 0 : i32
    %c0_i32_0 = arith.constant 0 : i32
    %c0_i32_1 = arith.constant 0 : i32
    return %arg0, %c0_i32, %c0_i32_0 : i32, i32, i32
  }
  func.func @transform_13(%arg0: i32) -> (i32, i32, i32) {
    %c0_i32 = arith.constant 0 : i32
    %c0_i32_0 = arith.constant 0 : i32
    %c0_i32_1 = arith.constant 0 : i32
    return %arg0, %c0_i32, %c0_i32_0 : i32, i32, i32
  }
  func.func @transform_14(%arg0: i32) -> (i32, i32, i32) {
    %c0_i32 = arith.constant 0 : i32
    %c0_i32_0 = arith.constant 0 : i32
    %c0_i32_1 = arith.constant 0 : i32
    return %arg0, %c0_i32, %c0_i32_0 : i32, i32, i32
  }
  func.func @transform_15(%arg0: i32) -> (i32, i32, i32) {
    %c0_i32 = arith.constant 0 : i32
    %c0_i32_0 = arith.constant 0 : i32
    %c0_i32_1 = arith.constant 0 : i32
    %c0_i32_2 = arith.constant 0 : i32
    return %c0_i32, %c0_i32_0, %c0_i32_1 : i32, i32, i32
  }
}

</mosaic_0001>

<bundles_post_ra>
// kernel: triple_transformer_forward.1
= control target key start
LH: loop header
LB: loop body
LE: loop exit
PB: predicated region body
PF: predicated region fallthrough
CT: control target
= control target key end

     0   :  { %s2812_s0 = inlined_call_operand.vmem [shape: f32[2,8,32], index: 0, kind: input, shape index: {}]   ;;  %s2813_s1 = inlined_call_operand.vmem [shape: f32[8,32], index: 1, kind: input, shape index: {}]   ;;  %s2814_s2 = inlined_call_operand.vmem [shape: f32[2,8,32], index: 2, kind: input, shape index: {}]   ;;  %s2815_s3 = inlined_call_operand.vmem [shape: bf16[2,12,32,8], index: 3, kind: input, shape index: {}]   ;;  %s2816_s4 = inlined_call_operand.vmem [shape: f32[2,12,1,8], index: 4, kind: input, shape index: {}]   ;;  %s2817_s5 = inlined_call_operand.vmem [shape: bf16[2,4,8,32], index: 5, kind: input, shape index: {}]   ;;  %s2818_s6 = inlined_call_operand.vmem [shape: f32[2,1,32], index: 6, kind: input, shape index: {}]   ;;  %s2819_s7 = inlined_call_operand.vmem [shape: f32[2,1,32], index: 7, kind: input, shape index: {}]   ;;  %s2820_s8 = inlined_call_operand.vmem [shape: f32[2,1,32], index: 8, kind: input, shape index: {}]   ;;  %s2821_s9 = inlined_call_operand.vmem [shape: bf16[2,32,64], index: 9, kind: input, shape index: {}]   ;;  %s2822_s10 = inlined_call_operand.vmem [shape: f32[2,1,64], index: 10, kind: input, shape index: {}]   ;;  %s2823_s11 = inlined_call_operand.vmem [shape: bf16[2,64,32], index: 11, kind: input, shape index: {}]   ;;  %s2824_s12 = inlined_call_operand.vmem [shape: f32[2,1,32], index: 12, kind: input, shape index: {}]   ;;  %s2825_s13 = inlined_call_operand.vmem [shape: f32[2,1,32], index: 13, kind: input, shape index: {}]   ;;  %s2826_s14 = inlined_call_operand.vmem [shape: f32[2,1,32], index: 14, kind: input, shape index: {}]   ;;  %s2827_s15 = inlined_call_operand.hbm [shape: f32[2,8,32], index: 15, kind: output, shape index: {}]  }
   0x1   :  { %2832 = sst [smem:[#allocation8_spill]] %s2812_s0 }
   0x2   :  { %2833 = sst [smem:[#allocation9_spill]] %s2813_s1 }
   0x3   :  { %2834 = sst [smem:[#allocation10_spill]] %s2814_s2 }
   0x4   :  { %2835 = sst [smem:[#allocation11_spill]] %s2815_s3 }
   0x5   :  { %2836 = sst [smem:[#allocation12_spill]] %s2816_s4 }
   0x6   :  { %2837 = sst [smem:[#allocation13_spill]] %s2817_s5 }
   0x7   :  { %2838 = sst [smem:[#allocation14_spill]] %s2827_s15 }
   0x8   :  { %20 = vsyncpa [#allocation4], 0  ;;  %s2501_s18 = smov 0  }
   0x9 LB: > { %2839 = sst [smem:[#allocation6_spill]] %s2415_s18  ;;  %s2507_s19 = sadd.s32 4294967295, %s2415_s18   ;;  %s2415_s18 = sphi %s2501_s18, %s26_s18  }
   0xa   : > { %p2037_p0 = scmp.ge.s32.totalorder %s2415_s18, 1  ;;  %p528_p1 = scmp.lt.s32.totalorder %s2415_s18, 3 }
   0xc   : > { %p529_p2 = pnand %p2037_p0, %p528_p1 }
   0xe   : > { %532 = sbr.rel (%p529_p2) target bundleno = 3181 (0xc6d), region = 80 }
  0x13   : > { %p611_p3 = scmp.lt.s32.totalorder %s2507_s19, 1  ;;  %s2840_s5 = sld [smem:[#allocation13_spill]] }
  0x14   : > { %s2842_s3 = sld [smem:[#allocation11_spill]]  ;;  %p2045_p4 = scmp.ne.s32.totalorder %s2507_s19, 0 }
  0x15   : > { %s2513_s20 = scalar_select %p611_p3, %s2507_s19, 1 }
  0x16   : > { %s2843_s4 = sld [smem:[#allocation12_spill]] }
  0x17   : > { %s2296_s21 = smul.u32 192, %s2513_s20  ;;  %s2263_s22 = sshll.u32 %s2513_s20, 4 }
  0x18   : > { %s2297_s23 = smul.u32 12, %s2513_s20  ;;  %s2548_s28 = scalar_lea.vmem %s2821_s9, %s2263_s22 }
  0x19   : > { %s2521_s26 = scalar_lea.vmem %s2840_s5, %s2263_s22  ;;  %s2265_s15 = sshll.u32 %s2513_s20, 5 }
  0x1a   : > { %2841 = sst [smem:[#allocation7_spill]] %s2521_s26  ;;  %s2526_s29 = scalar_lea.vmem %s2842_s3, %s2296_s21 }
  0x1b   : > { %s2558_s3 = scalar_lea.vmem %s2823_s11, %s2265_s15  ;;  %s649_s5 = scalar_lea.vmem %s2824_s12, %s2513_s20 }
  0x1c   : > { %s2535_s2 = scalar_lea.vmem %s2843_s4, %s2297_s23  ;;  %s652_s27 = scalar_lea.vmem %s2825_s13, %s2513_s20 }
  0x1d   : > { %660 = sbr.rel (%p2045_p4) target bundleno = 44 (0x2c), region = 84  ;;  %s2844_s18 = sld [smem:[#allocation8_spill]] (!%p2045_p4) }
  0x1e   : > { %s2846_s4 = sld [smem:[#allocation9_spill]] (!%p2045_p4) }
  0x1f   : > { %s2847_s22 = sld [smem:[#allocation10_spill]] (!%p2045_p4) }
  0x22   : > { %vm672_vm0 = vcmask 261120  }
  0x23   : > { %s2845_s23 = smov %s2844_s18  ;;  %v661_v0 = vld [vmem:[%s2844_s18] sm:$0xff] }
  0x24   : > { %v665_v1 = vld [vmem:[%s2846_s4] sm:$0xff]  ;;  %v663_v2 = vmul.f32 5.656854, %v661_v0  ;;  %v662_v3 = vld [vmem:[%s2845_s23 + $0x8] sm:$0xff] }
  0x25   : > { %v668_v4 = vld [vmem:[%s2847_s22] sm:$0xff]  ;;  %v664_v5 = vmul.f32 5.656854, %v662_v3  ;;  %v669_v7 = vld [vmem:[%s2847_s22 + $0x8] sm:$0xff] }
  0x26   : > { %v666_v6 = vadd.f32 %v665_v1, %v663_v2 }
  0x27   : > { %v667_v8 = vadd.f32 %v665_v1, %v664_v5 }
  0x28   : > { %v670_v9 = vadd.f32 %v668_v4, %v666_v6 }
  0x29   : > { %v671_v10 = vadd.f32 %v669_v7, %v667_v8 }
  0x2a   : > { %673 = vst.msk [vmem:[#allocation2] sm:$0xff] %vm672_vm0, %v670_v9 }
  0x2b   : > { %674 = vst.msk [vmem:[#allocation2 + $0x8] sm:$0xff] %vm672_vm0, %v671_v10 }
  0x2c PF: > { %v2267_v11 = vld [vmem:[%s2526_s29 + $0x8] sm:$0xff]  ;;  %v2266_v13 = vld [vmem:[%s2526_s29] sm:$0xff]  ;;  %vm698_vm1 = vcmask 261120   ;;  %vm792_vm2 = vcmask 64512   ;;  %v2273_v24 = vld [vmem:[%s2526_s29 + $0x18] sm:$0xff]  ;;  %vm862_vm3 = vcmask 1043456   ;;  %s2849_s17 = scalar_lea.vmem %s2818_s6, %s2513_s20  ;;  %s2850_s30 = scalar_lea.vmem %s2819_s7, %s2513_s20 }
  0x2d   : > { %v2269_v12 = vld [vmem:[%s2526_s29 + $0x48] sm:$0xff]  ;;  %v2268_v14 = vld [vmem:[%s2526_s29 + $0x40] sm:$0xff]  ;;  %708 = vmatpush.bf16.msra.mxu0 %v2267_v11  ;;  %v2272_v27 = vld [vmem:[%s2526_s29 + $0x10] sm:$0xff]  ;;  %s2848_s4 = sld [smem:[#allocation7_spill]]  ;;  %s2851_s15 = scalar_lea.vmem %s2820_s8, %s2513_s20  ;;  %vm1789_vm11 = vcmask 523264  }
  0x2e   : > { %744 = vmatpush.bf16.msra.mxu1 %v2269_v12  ;;  %v2317_v18 = vld [vmem:[%s2535_s2 + $0x4] ss:$0 sm:$0xff]  ;;  %v2316_v20 = vld [vmem:[%s2535_s2] ss:$0 sm:$0xff]  ;;  %v2275_v32 = vld [vmem:[%s2526_s29 + $0x58] sm:$0xff]  ;;  %s2852_s26 = scalar_lea.vmem %s2822_s10, %s2513_s20  ;;  %p2258_p5 = scmp.ne.s32.totalorder %s2507_s19, 1 }
  0x2f   : > { %v2274_v36 = vld [vmem:[%s2526_s29 + $0x50] sm:$0xff]  ;;  %v2271_v44 = vld [vmem:[%s2526_s29 + $0x88] sm:$0xff]  ;;  %v2270_v46 = vld [vmem:[%s2526_s29 + $0x80] sm:$0xff] }
  0x30   : > { %780 = vmatpush.bf16.msra.mxu2 %v2271_v44  ;;  %v2319_v48 = vld [vmem:[%s2535_s2 + $0x1] ss:$0 sm:$0xff]  ;;  %v2318_v50 = vld [vmem:[%s2535_s2 + $0x5] ss:$0 sm:$0xff]  ;;  %v2320_v7 = vld [vmem:[%s2535_s2 + $0x8] ss:$0 sm:$0xff] }
  0x31   : > { %v2592_v15 = vld [vmem:[#allocation2] sm:$0xff]  ;;  %709 = vmatpush.bf16.msra.mxu0 %v2266_v13 }
  0x32   : > { %v2594_v16 = vld [vmem:[#allocation2 + $0x8] sm:$0xff]  ;;  %745 = vmatpush.bf16.msra.mxu1 %v2268_v14 }
  0x33   : > { %v2598_v17 = vpack.c.bf16 %v2594_v16, %v2592_v15 }
  0x34   : > { %781 = vmatpush.bf16.msra.mxu2 %v2270_v46 }
  0x35   : > { %2054 = vmatmul.msk.bf16.vlgmr.msra.gmra.mxu0 %vm698_vm1, %v2598_v17  ;;  %2068 = vmatmul.msk.bf16.vlgmr.msra.gmra.mxu1 %vm698_vm1, %v2598_v17 }
  0x37   : > { %2082 = vmatmul.msk.bf16.vlgmr.msra.gmra.mxu2 %vm698_vm1, %v2598_v17 }
  0xb2   : > { %v747_v19 = vpop.f32.mrf.mxu1  ;;  %v711_v22 = vpop.f32.mrf.mxu0 }
  0xb3   : > { %v748_v21 = vadd.f32 %v2317_v18, %v747_v19  ;;  %v712_v25 = vadd.f32 %v2316_v20, %v711_v22 }
  0xb5   : > { %v790_v23 = vpack.c.bf16 %v748_v21, %v748_v21  ;;  %v788_v29 = vpack.c.bf16 %v712_v25, %v712_v25  ;;  %v2277_v25 = vld [vmem:[%s2526_s29 + $0x98] sm:$0xff] }
  0xb7   : > { %v797_v26 = vsel %vm792_vm2, %v790_v23, 0 }
  0xb8   : > { %806 = vmatpush.bf16.xpose.msra.mxu3 %v797_v26 }
  0xba   : > { %v749_v28 = vpop.f32.mrf.mxu1  ;;  %v713_v33 = vpop.f32.mrf.mxu0 }
  0xbb   : > { %v750_v30 = vadd.f32 %v2317_v18, %v749_v28  ;;  %v714_v35 = vadd.f32 %v2316_v20, %v713_v33  ;;  %v783_v8 = vpop.f32.mrf.mxu2 }
  0xbc   : > { %v784_v9 = vadd.f32 %v2320_v7, %v783_v8  ;;  %v2281_v8 = vld [vmem:[%s2526_s29 + $0x68] sm:$0xff] }
  0xbd   : > { %v791_v31 = vpack.c.bf16 %v750_v30, %v750_v30  ;;  %v789_v37 = vpack.c.bf16 %v714_v35, %v714_v35 }
  0xbe   : > { %v857_v10 = vpack.c.bf16 %v784_v9, %v784_v9  ;;  %v2280_v9 = vld [vmem:[%s2526_s29 + $0x60] sm:$0xff] }
  0xbf   : > { %2083 = vmatmul.msk.bf16.vlgmr.msra.gmra.mxu3 %vm792_vm2, %v788_v29  ;;  %v816_v34 = vsel %vm792_vm2, %v791_v31, 0 }
  0xc0   : > { %928 = vmatpush.bf16.msrb.mxu3 %v2273_v24  ;;  %825 = vmatpush.bf16.xpose.msrb.mxu0 %v816_v34  ;;  %v864_v11 = vsel %vm862_vm3, %v857_v10, 0  ;;  %v2279_v10 = vld [vmem:[%s2526_s29 + $0x28] sm:$0xff] }
  0xc1   : > { %873 = vmatpush.bf16.msrb.mxu1 %v864_v11  ;;  %v2278_v11 = vld [vmem:[%s2526_s29 + $0x20] sm:$0xff] }
  0xc3   : > { %v785_v13 = vpop.f32.mrf.mxu2 }
  0xc4   : > { %929 = vmatpush.bf16.msrb.mxu3 %v2272_v27  ;;  %v786_v14 = vadd.f32 %v2320_v7, %v785_v13  ;;  %v2276_v27 = vld [vmem:[%s2526_s29 + $0x90] sm:$0xff] }
  0xc5   : > { %1000 = vmatpush.bf16.msra.mxu1 %v2277_v25 }
  0xc6   : > { %v858_v18 = vpack.c.bf16 %v786_v14, %v786_v14 }
  0xc7   : > { %2084 = vmatmul.msk.bf16.vlgmr.msrb.gmra.mxu0 %vm792_vm2, %v789_v37 }
  0xc8   : > { %964 = vmatpush.bf16.msra.mxu0 %v2275_v32  ;;  %v883_v20 = vsel %vm862_vm3, %v858_v18, 0 }
  0xc9   : > { %892 = vmatpush.bf16.msrb.mxu2 %v883_v20  ;;  %1001 = vmatpush.bf16.msra.mxu1 %v2276_v27 }
  0xcc   : > { %965 = vmatpush.bf16.msra.mxu0 %v2274_v36 }
  0xcf   : > { %2100 = vmatmul.msk.bf16.vlgmr.msrb.gmra.mxu3 %vm698_vm1, %v2598_v17 }
  0xd7   : > { %2114 = vmatmul.msk.bf16.vlgmr.msra.gmra.mxu0 %vm698_vm1, %v2598_v17 }
 0x142   : > { %v808_v38 = vpop.f32.mrf.mxu3 }
 0x143   : > { %v831_v39 = vmul.f32 0.35355338, %v808_v38 }
 0x144   : > { %v827_v40 = vpop.f32.mrf.mxu0 }
 0x145   : > { %v832_v41 = vmul.f32 0.35355338, %v827_v40  ;;  %v833_v42 = vsel %vm792_vm2, %v831_v39, -inf }
 0x146   : > { %834 = vmax.xlane.f32.xlu1 %v833_v42 }
 0x147   : > { %v836_v43 = vsel %vm792_vm2, %v832_v41, -inf }
 0x148   : > { %837 = vmax.xlane.f32.xlu0 %v836_v43 }
 0x14a   : > { %v810_v45 = vpop.f32.mrf.mxu3 }
 0x14c   : > { %v829_v47 = vpop.f32.mrf.mxu0 }
 0x14d   : > { %v2321_v47 = vld [vmem:[%s2535_s2 + $0x9] ss:$0 sm:$0xff] }
 0x152   : > { %v931_v49 = vpop.f32.mrf.mxu3 }
 0x153   : > { %v2626_v51 = vadd.f32 %v2319_v48, %v931_v49 }
 0x154   : > { %v967_v52 = vpop.f32.mrf.mxu0 }
 0x155   : > { %v968_v53 = vadd.f32 %v2318_v50, %v967_v52  ;;  %v1008_v35 = vpack.c.bf16 %v2626_v51, %v2626_v51 }
 0x157   : > { %v1010_v12 = vpack.c.bf16 %v968_v53, %v968_v53 }
 0x159   : > { %v1016_v19 = vsel %vm792_vm2, %v1010_v12, 0 }
 0x15a   : > { %v933_v56 = vpop.f32.mrf.mxu3  ;;  %1025 = vmatpush.bf16.xpose.msra.mxu2 %v1016_v19  ;;  %v2133_v19 = vld [vmem:[%s2848_s4 + $0x4] sm:$0xf] }
 0x15b   : > { %v934_v59 = vadd.f32 %v2319_v48, %v933_v56  ;;  %v1123_v20 = vsel %vm862_vm3, %v2133_v19, 0 }
 0x15c   : > { %v969_v54 = vpop.f32.mrf.mxu0 }
 0x15d   : > { %v970_v55 = vadd.f32 %v2318_v50, %v969_v54  ;;  %v1009_v60 = vpack.c.bf16 %v934_v59, %v934_v59 }
 0x15f   : > { %v1011_v57 = vpack.c.bf16 %v970_v55, %v970_v55 }
 0x161   : > { %v1035_v58 = vsel %vm792_vm2, %v1011_v57, 0 }
 0x162   : > { %1044 = vmatpush.bf16.xpose.msra.mxu3 %v1035_v58 }
 0x169   : > { %2130 = vmatmul.msk.bf16.vlgmr.msra.gmra.mxu3 %vm792_vm2, %v1009_v60 }
 0x1b9   : > { %v835_v61 = vpop.xlane.xlu1 %834 }
 0x1ba   : > { %v839_v62 = vsub.f32 %v831_v39, %v835_v61 }
 0x1bb   : > { %v838_v63 = vpop.xlane.xlu0 %837 }
 0x1bc   : > { %v841_v0 = vmul.f32 1.442695, %v839_v62  ;;  %v840_v1 = vsub.f32 %v832_v41, %v838_v63  ;;  %v899_v41 = vld [vmem:[%s2848_s4] sm:$0xf] }
 0x1bd   : > { %v1143_v42 = vsel %vm862_vm3, %v899_v41, 0  ;;  %v2282_v41 = vld [vmem:[%s2526_s29 + $0xa0] sm:$0xff] }
 0x1be   : > { %2335 = vpow2.f32 %v841_v0  ;;  %v843_v2 = vmul.f32 1.442695, %v840_v1  ;;  %1152 = vmatpush.bf16.msrb.mxu3 %v1143_v42 }
 0x1c0   : > { %2337 = vpow2.f32 %v843_v2 }
 0x1c4   : > { %v2336_v3 = vpop.eup %2335 }
 0x1c5   : > { %v845_v4 = vsel %vm792_vm2, %v2336_v3, 0.0 }
 0x1c6   : > { %v2338_v5 = vpop.eup %2337  ;;  %846 = vadd.xlane.f32.xlu1 %v845_v4 }
 0x1c7   : > { %v848_v6 = vsel %vm792_vm2, %v2338_v5, 0.0 }
 0x1c8   : > { %849 = vadd.xlane.f32.xlu0 %v848_v6 }
 0x1ec   : > { %v1046_v21 = vpop.f32.mrf.mxu3 }
 0x1ed   : > { %v1051_v22 = vmul.f32 0.35355338, %v1046_v21 }
 0x1ef   : > { %v1055_v23 = vsel %vm792_vm2, %v1051_v22, -inf }
 0x1f0   : > { %1056 = vmax.xlane.f32.xlu2 %v1055_v23 }
 0x1f4   : > { %v1048_v24 = vpop.f32.mrf.mxu3 }
 0x239   : > { %v847_v26 = vpop.xlane.xlu1 %846 }
 0x23a   : > { %2339 = vrcp.f32 %v847_v26 }
 0x23b   : > { %v850_v28 = vpop.xlane.xlu0 %849 }
 0x23c   : > { %2341 = vrcp.f32 %v850_v28 }
 0x240   : > { %v2340_v29 = vpop.eup %2339 }
 0x241   : > { %v853_v30 = vmul.f32 %v2340_v29, %v2336_v3 }
 0x242   : > { %v2342_v31 = vpop.eup %2341 }
 0x243   : > { %v854_v32 = vmul.f32 %v2342_v31, %v2338_v5  ;;  %v855_v33 = vpack.c.bf16 %v853_v30, %v853_v30 }
 0x245   : > { %2085 = vmatmul.msk.bf16.vlgmr.msrb.gmra.mxu1 %vm792_vm2, %v855_v33  ;;  %v856_v34 = vpack.c.bf16 %v854_v32, %v854_v32  ;;  %v2323_v33 = vld [vmem:[%s2535_s2 + $0x2] ss:$0 sm:$0xff] }
 0x247   : > { %2086 = vmatmul.msk.bf16.vlgmr.msrb.gmra.mxu2 %vm792_vm2, %v856_v34 }
 0x248   : > { %1132 = vmatpush.bf16.msrb.mxu2 %v1123_v20 }
 0x255   : > { %2128 = vmatmul.msk.bf16.vlgmr.msra.gmra.mxu1 %vm698_vm1, %v2598_v17 }
 0x257   : > { %2129 = vmatmul.msk.bf16.vlgmr.msra.gmra.mxu2 %vm792_vm2, %v1008_v35 }
 0x263   : > { %v1057_v36 = vpop.xlane.xlu2 %1056 }
 0x264   : > { %v1059_v37 = vsub.f32 %v1051_v22, %v1057_v36  ;;  %v2322_v22 = vld [vmem:[%s2535_s2 + $0x6] ss:$0 sm:$0xff] }
 0x266   : > { %v1062_v38 = vmul.f32 1.442695, %v1059_v37 }
 0x268   : > { %2343 = vpow2.f32 %v1062_v38 }
 0x26e   : > { %v2344_v39 = vpop.eup %2343 }
 0x26f   : > { %v1067_v40 = vsel %vm792_vm2, %v2344_v39, 0.0 }
 0x270   : > { %1068 = vadd.xlane.f32.xlu0 %v1067_v40  ;;  %v2283_v40 = vld [vmem:[%s2526_s29 + $0xa8] sm:$0xff] }
 0x271   : > { %1259 = vmatpush.bf16.msra.mxu2 %v2283_v40 }
 0x275   : > { %1260 = vmatpush.bf16.msra.mxu2 %v2282_v41 }
 0x2c2   : > { %v875_v43 = vpop.f32.mrf.mxu1 }
 0x2ca   : > { %v877_v44 = vpop.f32.mrf.mxu1  ;;  %v894_v45 = vpop.f32.mrf.mxu2 }
 0x2cb   : > { %v898_v46 = vpack.c.bf16 %v894_v45, %v875_v43 }
 0x2cd   : > { %2135 = vmatmul.msk.bf16.vlgmr.msrb.gmra.mxu3 %vm792_vm2, %v898_v46 }
 0x2d2   : > { %v896_v48 = vpop.f32.mrf.mxu2  ;;  %v1003_v49 = vpop.f32.mrf.mxu1 }
 0x2d3   : > { %v1004_v50 = vadd.f32 %v2321_v47, %v1003_v49 }
 0x2d5   : > { %v1076_v51 = vpack.c.bf16 %v1004_v50, %v1004_v50 }
 0x2d7   : > { %v1082_v52 = vsel %vm862_vm3, %v1076_v51, 0 }
 0x2d8   : > { %1091 = vmatpush.bf16.msrb.mxu0 %v1082_v52 }
 0x2da   : > { %v1027_v53 = vpop.f32.mrf.mxu2  ;;  %v1005_v54 = vpop.f32.mrf.mxu1 }
 0x2db   : > { %v1050_v55 = vmul.f32 0.35355338, %v1027_v53  ;;  %v1006_v56 = vadd.f32 %v2321_v47, %v1005_v54  ;;  %v2324_v54 = vld [vmem:[%s2535_s2 + $0xa] ss:$0 sm:$0xff] }
 0x2dc   : > { %1187 = vmatpush.bf16.msra.mxu0 %v2279_v10  ;;  %v2286_v10 = vld [vmem:[%s2526_s29 + $0x70] sm:$0xff] }
 0x2dd   : > { %v1052_v57 = vsel %vm792_vm2, %v1050_v55, -inf  ;;  %v1077_v58 = vpack.c.bf16 %v1006_v56, %v1006_v56 }
 0x2de   : > { %1053 = vmax.xlane.f32.xlu2 %v1052_v57 }
 0x2df   : > { %v1101_v59 = vsel %vm862_vm3, %v1077_v58, 0 }
 0x2e0   : > { %1110 = vmatpush.bf16.msrb.mxu1 %v1101_v59  ;;  %1188 = vmatpush.bf16.msra.mxu0 %v2278_v11  ;;  %v2285_v11 = vld [vmem:[%s2526_s29 + $0x38] sm:$0xff] }
 0x2e2   : > { %v1029_v60 = vpop.f32.mrf.mxu2 }
 0x2e3   : > { %v1069_v61 = vpop.xlane.xlu0 %1068 }
 0x2e4   : > { %2345 = vrcp.f32 %v1069_v61  ;;  %1223 = vmatpush.bf16.msra.mxu1 %v2281_v8 }
 0x2e8   : > { %1224 = vmatpush.bf16.msra.mxu1 %v2280_v9  ;;  %v2287_v9 = vld [vmem:[%s2526_s29 + $0x78] sm:$0xff] }
 0x2ea   : > { %v2346_v62 = vpop.eup %2345 }
 0x2eb   : > { %v1073_v63 = vmul.f32 %v2346_v62, %v2344_v39 }
 0x2ed   : > { %v1075_v0 = vpack.c.bf16 %v1073_v63, %v1073_v63 }
 0x2ef   : > { %2132 = vmatmul.msk.bf16.vlgmr.msrb.gmra.mxu1 %vm792_vm2, %v1075_v0 }
 0x2ff   : > { %2163 = vmatmul.msk.bf16.vlgmr.msra.gmra.mxu1 %vm698_vm1, %v2598_v17 }
 0x350   : > { %v2676_v42 = vpop.f32.mrf.mxu3 }
 0x351   : > { %v1054_v1 = vpop.xlane.xlu2 %1053 }
 0x352   : > { %v1058_v2 = vsub.f32 %v1050_v55, %v1054_v1 }
 0x354   : > { %v1060_v3 = vmul.f32 1.442695, %v1058_v2 }
 0x356   : > { %2347 = vpow2.f32 %v1060_v3 }
 0x358   : > { %v2680_v43 = vpop.f32.mrf.mxu3 }
 0x35c   : > { %v2348_v4 = vpop.eup %2347 }
 0x35d   : > { %v1064_v5 = vsel %vm792_vm2, %v2348_v4, 0.0 }
 0x35e   : > { %1065 = vadd.xlane.f32.xlu1 %v1064_v5 }
 0x36c   : > { %v1112_v6 = vpop.f32.mrf.mxu1 }
 0x374   : > { %v1114_v7 = vpop.f32.mrf.mxu1 }
 0x37c   : > { %v1226_v21 = vpop.f32.mrf.mxu1 }
 0x37d   : > { %v1227_v23 = vadd.f32 %v2322_v22, %v1226_v21 }
 0x37f   : > { %v1269_v24 = vpack.c.bf16 %v1227_v23, %v1227_v23 }
 0x381   : > { %v1275_v25 = vsel %vm792_vm2, %v1269_v24, 0  ;;  %v2182_v24 = vld [vmem:[%s2848_s4 + $0x8] sm:$0xf] }
 0x382   : > { %1284 = vmatpush.bf16.xpose.msra.mxu3 %v1275_v25  ;;  %v1382_v25 = vsel %vm862_vm3, %v2182_v24, 0 }
 0x384   : > { %v1228_v26 = vpop.f32.mrf.mxu1 }
 0x385   : > { %v1229_v27 = vadd.f32 %v2322_v22, %v1228_v26 }
 0x387   : > { %v1270_v28 = vpack.c.bf16 %v1229_v27, %v1229_v27 }
 0x389   : > { %v1294_v29 = vsel %vm792_vm2, %v1270_v28, 0 }
 0x38a   : > { %1391 = vmatpush.bf16.msrb.mxu3 %v1382_v25 }
 0x3d1   : > { %v1066_v12 = vpop.xlane.xlu1 %1065 }
 0x3d2   : > { %2349 = vrcp.f32 %v1066_v12  ;;  %v2284_v12 = vld [vmem:[%s2526_s29 + $0x30] sm:$0xff] }
 0x3d8   : > { %v2350_v13 = vpop.eup %2349 }
 0x3d9   : > { %v1072_v14 = vmul.f32 %v2350_v13, %v2348_v4 }
 0x3db   : > { %v1074_v18 = vpack.c.bf16 %v1072_v14, %v1072_v14 }
 0x3dd   : > { %2131 = vmatmul.msk.bf16.vlgmr.msrb.gmra.mxu0 %vm792_vm2, %v1074_v18 }
 0x3de   : > { %1303 = vmatpush.bf16.xpose.msrb.mxu0 %v1294_v29 }
 0x3ed   : > { %2149 = vmatmul.msk.bf16.vlgmr.msra.gmra.mxu0 %vm698_vm1, %v2598_v17 }
 0x3ee   : > { %1428 = vmatpush.bf16.msra.mxu0 %v2285_v11 }
 0x3f2   : > { %1429 = vmatpush.bf16.msra.mxu0 %v2284_v12 }
 0x45a   : > { %v1093_v30 = vpop.f32.mrf.mxu0 }
 0x45b   : > { %v1116_v31 = vpack.c.bf16 %v1112_v6, %v1093_v30  ;;  %v2325_v30 = vld [vmem:[%s2535_s2 + $0x7] ss:$0 sm:$0xff] }
 0x45d   : > { %2134 = vmatmul.msk.bf16.vlgmr.msrb.gmra.mxu2 %vm792_vm2, %v1116_v31 }
 0x462   : > { %v1095_v32 = vpop.f32.mrf.mxu0 }
 0x46a   : > { %v1190_v34 = vpop.f32.mrf.mxu0 }
 0x46b   : > { %v1191_v35 = vadd.f32 %v2323_v33, %v1190_v34  ;;  %v2326_v34 = vld [vmem:[%s2535_s2 + $0x3] ss:$0 sm:$0xff] }
 0x46d   : > { %v1267_v36 = vpack.c.bf16 %v1191_v35, %v1191_v35  ;;  %2177 = vmatmul.msk.bf16.vlgmr.msra.gmra.mxu2 %vm698_vm1, %v2598_v17 }
 0x46f   : > { %2178 = vmatmul.msk.bf16.vlgmr.msra.gmra.mxu3 %vm792_vm2, %v1267_v36 }
 0x472   : > { %v1192_v37 = vpop.f32.mrf.mxu0 }
 0x473   : > { %v1193_v38 = vadd.f32 %v2323_v33, %v1192_v37 }
 0x475   : > { %v1268_v39 = vpack.c.bf16 %v1193_v38, %v1193_v38 }
 0x477   : > { %2179 = vmatmul.msk.bf16.vlgmr.msrb.gmra.mxu0 %vm792_vm2, %v1268_v39 }
 0x487   : > { %2197 = vmatmul.msk.bf16.vlgmr.msra.gmra.mxu0 %vm698_vm1, %v2598_v17 }
 0x4e0   : > { %v2684_v52 = vpop.f32.mrf.mxu2 }
 0x4e8   : > { %v2686_v53 = vpop.f32.mrf.mxu2 }
 0x4f0   : > { %v1262_v55 = vpop.f32.mrf.mxu2 }
 0x4f1   : > { %v1263_v57 = vadd.f32 %v2324_v54, %v1262_v55 }
 0x4f2   : > { %v1286_v44 = vpop.f32.mrf.mxu3 }
 0x4f3   : > { %v1309_v45 = vmul.f32 0.35355338, %v1286_v44  ;;  %v1335_v60 = vpack.c.bf16 %v1263_v57, %v1263_v57 }
 0x4f4   : > { %v1305_v46 = vpop.f32.mrf.mxu0 }
 0x4f5   : > { %v1310_v47 = vmul.f32 0.35355338, %v1305_v46  ;;  %v1311_v48 = vsel %vm792_vm2, %v1309_v45, -inf  ;;  %v1341_v63 = vsel %vm862_vm3, %v1335_v60, 0 }
 0x4f6   : > { %1312 = vmax.xlane.f32.xlu2 %v1311_v48  ;;  %1350 = vmatpush.bf16.msrb.mxu1 %v1341_v63 }
 0x4f7   : > { %v1314_v49 = vsel %vm792_vm2, %v1310_v47, -inf }
 0x4f8   : > { %1315 = vmax.xlane.f32.xlu0 %v1314_v49  ;;  %v1264_v1 = vpop.f32.mrf.mxu2  ;;  %v2289_v49 = vld [vmem:[%s2526_s29 + $0xb8] sm:$0xff] }
 0x4f9   : > { %v1265_v2 = vadd.f32 %v2324_v54, %v1264_v1  ;;  %v2327_v1 = vld [vmem:[%s2535_s2 + $0xb] ss:$0 sm:$0xff] }
 0x4fa   : > { %v1288_v50 = vpop.f32.mrf.mxu3  ;;  %1464 = vmatpush.bf16.msra.mxu1 %v2287_v9 }
 0x4fb   : > { %v1336_v3 = vpack.c.bf16 %v1265_v2, %v1265_v2  ;;  %v2288_v50 = vld [vmem:[%s2526_s29 + $0xb0] sm:$0xff]  ;;  %s2853_s29 = scalar_lea.vmem %s2826_s14, %s2513_s20 }
 0x4fc   : > { %v1307_v51 = vpop.f32.mrf.mxu0 }
 0x4fd   : > { %v1360_v6 = vsel %vm862_vm3, %v1336_v3, 0  ;;  %v1155_v51 = vadd.f32 %v2676_v42, %v2684_v52 }
 0x4fe   : > { %1369 = vmatpush.bf16.msrb.mxu2 %v1360_v6  ;;  %1465 = vmatpush.bf16.msra.mxu1 %v2286_v10 }
 0x502   : > { %1500 = vmatpush.bf16.msra.mxu2 %v2289_v49 }
 0x504   : > { %v1431_v35 = vpop.f32.mrf.mxu0 }
 0x505   : > { %v1432_v38 = vadd.f32 %v2326_v34, %v1431_v35  ;;  %v2328_v35 = vld [vmem:[%s2849_s17] ss:$0 sm:$0xff] }
 0x506   : > { %1501 = vmatpush.bf16.msra.mxu2 %v2288_v50 }
 0x507   : > { %v1508_v40 = vpack.c.bf16 %v1432_v38, %v1432_v38 }
 0x569   : > { %v1313_v56 = vpop.xlane.xlu2 %1312 }
 0x56a   : > { %v1317_v58 = vsub.f32 %v1309_v45, %v1313_v56  ;;  %v1433_v45 = vpop.f32.mrf.mxu0  ;;  %v1157_v56 = vadd.f32 %v2680_v43, %v2686_v53 }
 0x56b   : > { %v1316_v59 = vpop.xlane.xlu0 %1315 }
 0x56c   : > { %v1319_v61 = vmul.f32 1.442695, %v1317_v58  ;;  %v1318_v62 = vsub.f32 %v1310_v47, %v1316_v59  ;;  %v1434_v47 = vadd.f32 %v2326_v34, %v1433_v45 }
 0x56e   : > { %2351 = vpow2.f32 %v1319_v61  ;;  %v1321_v0 = vmul.f32 1.442695, %v1318_v62  ;;  %v1509_v48 = vpack.c.bf16 %v1434_v47, %v1434_v47 }
 0x570   : > { %2353 = vpow2.f32 %v1321_v0 }
 0x574   : > { %v2352_v4 = vpop.eup %2351 }
 0x575   : > { %v1323_v5 = vsel %vm792_vm2, %v2352_v4, 0.0 }
 0x576   : > { %v2354_v7 = vpop.eup %2353  ;;  %1324 = vadd.xlane.f32.xlu1 %v1323_v5 }
 0x577   : > { %v1326_v8 = vsel %vm792_vm2, %v2354_v7, 0.0 }
 0x578   : > { %1327 = vadd.xlane.f32.xlu2 %v1326_v8 }
 0x5e9   : > { %v1325_v13 = vpop.xlane.xlu1 %1324 }
 0x5ea   : > { %2355 = vrcp.f32 %v1325_v13 }
 0x5eb   : > { %v1328_v14 = vpop.xlane.xlu2 %1327 }
 0x5ec   : > { %2357 = vrcp.f32 %v1328_v14 }
 0x5f0   : > { %v2356_v18 = vpop.eup %2355 }
 0x5f1   : > { %v1331_v19 = vmul.f32 %v2356_v18, %v2352_v4 }
 0x5f2   : > { %v2358_v20 = vpop.eup %2357 }
 0x5f3   : > { %v1333_v21 = vpack.c.bf16 %v1331_v19, %v1331_v19  ;;  %v1332_v22 = vmul.f32 %v2358_v20, %v2354_v7 }
 0x5f5   : > { %v1334_v23 = vpack.c.bf16 %v1332_v22, %v1332_v22  ;;  %2180 = vmatmul.msk.bf16.vlgmr.msrb.gmra.mxu1 %vm792_vm2, %v1333_v21 }
 0x5f7   : > { %2181 = vmatmul.msk.bf16.vlgmr.msrb.gmra.mxu2 %vm792_vm2, %v1334_v23 }
 0x605   : > { %2211 = vmatmul.msk.bf16.vlgmr.msra.gmra.mxu1 %vm698_vm1, %v2598_v17 }
 0x607   : > { %2225 = vmatmul.msk.bf16.vlgmr.msra.gmra.mxu2 %vm698_vm1, %v2598_v17 }
 0x672   : > { %v1352_v26 = vpop.f32.mrf.mxu1 }
 0x67a   : > { %v1354_v27 = vpop.f32.mrf.mxu1  ;;  %v1371_v28 = vpop.f32.mrf.mxu2 }
 0x67b   : > { %v1375_v29 = vpack.c.bf16 %v1371_v28, %v1352_v26  ;;  %v2230_v28 = vld [vmem:[%s2848_s4 + $0xc] sm:$0xf] }
 0x67d   : > { %2183 = vmatmul.msk.bf16.vlgmr.msrb.gmra.mxu3 %vm792_vm2, %v1375_v29  ;;  %v1623_v29 = vsel %vm862_vm3, %v2230_v28, 0 }
 0x682   : > { %v1373_v31 = vpop.f32.mrf.mxu2  ;;  %v1467_v32 = vpop.f32.mrf.mxu1 }
 0x683   : > { %v1468_v33 = vadd.f32 %v2325_v30, %v1467_v32 }
 0x685   : > { %v1510_v36 = vpack.c.bf16 %v1468_v33, %v1468_v33 }
 0x687   : > { %v1516_v37 = vsel %vm792_vm2, %v1510_v36, 0 }
 0x688   : > { %1525 = vmatpush.bf16.xpose.msra.mxu3 %v1516_v37 }
 0x68a   : > { %v1469_v39 = vpop.f32.mrf.mxu1  ;;  %v1503_v17 = vpop.f32.mrf.mxu2 }
 0x68b   : > { %v1470_v41 = vadd.f32 %v2325_v30, %v1469_v39  ;;  %v1504_v3 = vadd.f32 %v2327_v1, %v1503_v17  ;;  %v2290_v17 = vld [vmem:[%s2548_s28] sm:$0xff] }
 0x68d   : > { %v1511_v44 = vpack.c.bf16 %v1470_v41, %v1470_v41  ;;  %v1576_v4 = vpack.c.bf16 %v1504_v3, %v1504_v3 }
 0x68f   : > { %v1535_v46 = vsel %vm792_vm2, %v1511_v44, 0  ;;  %2226 = vmatmul.msk.bf16.vlgmr.msra.gmra.mxu3 %vm792_vm2, %v1508_v40  ;;  %v1582_v7 = vsel %vm862_vm3, %v1576_v4, 0 }
 0x690   : > { %1544 = vmatpush.bf16.xpose.msrb.mxu0 %v1535_v46  ;;  %1591 = vmatpush.bf16.msrb.mxu1 %v1582_v7 }
 0x691   : > { %1632 = vmatpush.bf16.msrb.mxu3 %v1623_v29 }
 0x692   : > { %v1505_v9 = vpop.f32.mrf.mxu2 }
 0x693   : > { %v1506_v10 = vadd.f32 %v2327_v1, %v1505_v9 }
 0x695   : > { %v1577_v11 = vpack.c.bf16 %v1506_v10, %v1506_v10 }
 0x697   : > { %2227 = vmatmul.msk.bf16.vlgmr.msrb.gmra.mxu0 %vm792_vm2, %v1509_v48  ;;  %v1601_v14 = vsel %vm862_vm3, %v1577_v11, 0  ;;  %v2417_v48 = vmov 32.0  }
 0x698   : > { %1610 = vmatpush.bf16.msrb.mxu2 %v1601_v14 }
 0x700   : > { %v1393_v54 = vpop.f32.mrf.mxu3 }
 0x701   : > { %v2716_v55 = vadd.f32 %v1393_v54, %v1155_v51 }
 0x708   : > { %v1395_v57 = vpop.f32.mrf.mxu3 }
 0x709   : > { %v2722_v58 = vadd.f32 %v1395_v57, %v1157_v56 }
 0x712   : > { %v1527_v59 = vpop.f32.mrf.mxu3 }
 0x713   : > { %v1550_v60 = vmul.f32 0.35355338, %v1527_v59 }
 0x714   : > { %v1546_v61 = vpop.f32.mrf.mxu0 }
 0x715   : > { %v1551_v62 = vmul.f32 0.35355338, %v1546_v61  ;;  %v1552_v42 = vsel %vm792_vm2, %v1550_v60, -inf }
 0x716   : > { %1553 = vmax.xlane.f32.xlu1 %v1552_v42 }
 0x717   : > { %v1555_v52 = vsel %vm792_vm2, %v1551_v62, -inf }
 0x718   : > { %1556 = vmax.xlane.f32.xlu0 %v1555_v52 }
 0x71a   : > { %v1529_v63 = vpop.f32.mrf.mxu3 }
 0x71b   : > { %v2291_v63 = vld [vmem:[%s2548_s28 + $0x8] sm:$0xff] }
 0x71c   : > { %v1548_v0 = vpop.f32.mrf.mxu0  ;;  %1742 = vmatpush.bf16.msra.mxu0 %v2291_v63 }
 0x720   : > { %1743 = vmatpush.bf16.msra.mxu0 %v2290_v17 }
 0x789   : > { %v1554_v2 = vpop.xlane.xlu1 %1553 }
 0x78a   : > { %v1558_v43 = vsub.f32 %v1550_v60, %v1554_v2 }
 0x78b   : > { %v1557_v53 = vpop.xlane.xlu0 %1556 }
 0x78c   : > { %v1560_v5 = vmul.f32 1.442695, %v1558_v43  ;;  %v1559_v6 = vsub.f32 %v1551_v62, %v1557_v53 }
 0x78e   : > { %2359 = vpow2.f32 %v1560_v5  ;;  %v1562_v8 = vmul.f32 1.442695, %v1559_v6 }
 0x790   : > { %2361 = vpow2.f32 %v1562_v8 }
 0x794   : > { %v2360_v12 = vpop.eup %2359 }
 0x795   : > { %v1564_v13 = vsel %vm792_vm2, %v2360_v12, 0.0 }
 0x796   : > { %v2362_v18 = vpop.eup %2361  ;;  %1565 = vadd.xlane.f32.xlu0 %v1564_v13 }
 0x797   : > { %v1567_v19 = vsel %vm792_vm2, %v2362_v18, 0.0 }
 0x798   : > { %1568 = vadd.xlane.f32.xlu2 %v1567_v19  ;;  %v2329_v19 = vld [vmem:[%s2850_s30] ss:$0 sm:$0xff] }
 0x809   : > { %v1566_v20 = vpop.xlane.xlu0 %1565 }
 0x80a   : > { %2363 = vrcp.f32 %v1566_v20 }
 0x80b   : > { %v1569_v21 = vpop.xlane.xlu2 %1568 }
 0x80c   : > { %2365 = vrcp.f32 %v1569_v21 }
 0x80d   : > { %2367 = vrcp.f32 %v2417_v48 }
 0x810   : > { %v2364_v22 = vpop.eup %2363 }
 0x811   : > { %v1572_v23 = vmul.f32 %v2364_v22, %v2360_v12 }
 0x812   : > { %v2366_v24 = vpop.eup %2365 }
 0x813   : > { %v1574_v25 = vpack.c.bf16 %v1572_v23, %v1572_v23  ;;  %v1573_v26 = vmul.f32 %v2366_v24, %v2362_v18  ;;  %v2368_v49 = vpop.eup %2367  ;;  %v2330_v23 = vld [vmem:[%s2851_s15] ss:$0 sm:$0xff] }
 0x814   : > { %v1658_v50 = vmul.f32 32.0, %v2368_v49  ;;  %vm1662_vm4 = vweird.f32 %v2368_v49 }
 0x815   : > { %v1575_v27 = vpack.c.bf16 %v1573_v26, %v1573_v26  ;;  %2228 = vmatmul.msk.bf16.vlgmr.msrb.gmra.mxu1 %vm792_vm2, %v1574_v25 }
 0x816   : > { %v1659_v51 = vsub.f32 1.0, %v1658_v50 }
 0x817   : > { %2229 = vmatmul.msk.bf16.vlgmr.msrb.gmra.mxu2 %vm792_vm2, %v1575_v27 }
 0x818   : > { %v1660_v54 = vmul.f32 %v2368_v49, %v1659_v51 }
 0x892   : > { %v1593_v30 = vpop.f32.mrf.mxu1 }
 0x89a   : > { %v1595_v31 = vpop.f32.mrf.mxu1  ;;  %v1612_v32 = vpop.f32.mrf.mxu2 }
 0x89b   : > { %v1616_v33 = vpack.c.bf16 %v1612_v32, %v1593_v30  ;;  %v2295_v30 = vld [vmem:[%s2558_s3 + $0x18] sm:$0xff]  ;;  %v2294_v31 = vld [vmem:[%s2558_s3 + $0x10] sm:$0xff]  ;;  %v2293_v32 = vld [vmem:[%s2558_s3 + $0x8] sm:$0xff] }
 0x89c   : > { %1797 = vmatpush.bf16.msra.mxu1 %v2295_v30 }
 0x89d   : > { %2231 = vmatmul.msk.bf16.vlgmr.msrb.gmra.mxu3 %vm792_vm2, %v1616_v33  ;;  %v2292_v33 = vld [vmem:[%s2558_s3] sm:$0xff] }
 0x8a0   : > { %1798 = vmatpush.bf16.msra.mxu1 %v2294_v31 }
 0x8a2   : > { %v1614_v34 = vpop.f32.mrf.mxu2 }
 0x8a4   : > { %1799 = vmatpush.bf16.msra.mxu1 %v2293_v32 }
 0x8a8   : > { %1800 = vmatpush.bf16.msra.mxu1 %v2292_v33 }
 0x920   : > { %v1634_v36 = vpop.f32.mrf.mxu3 }
 0x921   : > { %v1639_v37 = vadd.f32 %v1634_v36, %v2716_v55 }
 0x923   : > { %v1645_v38 = vadd.f32 %v2328_v35, %v1639_v37 }
 0x925   : > { %v1647_v39 = vadd.f32 %v1645_v38, %v2592_v15  ;;  %v1661_v15 = vadd.f32 %v2368_v49, %v1660_v54 }
 0x927   : > { %v1651_v40 = vsel %vm698_vm1, %v1647_v39, 0.0  ;;  %v2747_v55 = vsel %vm1662_vm4, %v2368_v49, %v1661_v15 }
 0x928   : > { %1652 = vadd.xlane.f32.xlu1 %v1651_v40  ;;  %v1636_v41 = vpop.f32.mrf.mxu3 }
 0x929   : > { %v1640_v44 = vadd.f32 %v1636_v41, %v2722_v58 }
 0x92b   : > { %v1646_v45 = vadd.f32 %v2328_v35, %v1640_v44  ;;  %v2331_v35 = vld [vmem:[%s2852_s26] ss:$0 sm:$0xff] }
 0x92c   : > { %v2332_v44 = vld [vmem:[%s649_s5] ss:$0 sm:$0xff] }
 0x92d   : > { %v1648_v46 = vadd.f32 %v1646_v45, %v2594_v16 }
 0x92f   : > { %v1654_v47 = vsel %vm698_vm1, %v1648_v46, 0.0 }
 0x930   : > { %1655 = vadd.xlane.f32.xlu2 %v1654_v47 }
 0x99b   : > { %v1653_v56 = vpop.xlane.xlu1 %1652 }
 0x99c   : > { %v1664_v57 = vmul.f32 %v2747_v55, %v1653_v56 }
 0x99e   : > { %v1666_v58 = vsub.f32 %v1647_v39, %v1664_v57 }
 0x9a0   : > { %v1668_v16 = vmul.f32 %v1666_v58, %v1666_v58 }
 0x9a2   : > { %v1670_v59 = vsel %vm698_vm1, %v1668_v16, 0.0 }
 0x9a3   : > { %1671 = vadd.xlane.f32.xlu0 %v1670_v59  ;;  %v1656_v60 = vpop.xlane.xlu2 %1655 }
 0x9a4   : > { %v1665_v61 = vmul.f32 %v2747_v55, %v1656_v60 }
 0x9a6   : > { %v1667_v62 = vsub.f32 %v1648_v46, %v1665_v61 }
 0x9a8   : > { %v1669_v42 = vmul.f32 %v1667_v62, %v1667_v62 }
 0x9aa   : > { %v1673_v52 = vsel %vm698_vm1, %v1669_v42, 0.0 }
 0x9ab   : > { %1674 = vadd.xlane.f32.xlu1 %v1673_v52 }
 0xa16   : > { %v1672_v0 = vpop.xlane.xlu0 %1671 }
 0xa17   : > { %v1676_v1 = vmul.f32 %v1672_v0, %v2747_v55 }
 0xa19   : > { %v1678_v2 = vadd.f32 1e-05, %v1676_v1 }
 0xa1b   : > { %2369 = vrsqrt.f32 %v1678_v2  ;;  %vm1686_vm6 = vweird.f32 %v1678_v2 }
 0xa1e   : > { %v1675_v3 = vpop.xlane.xlu1 %1674 }
 0xa1f   : > { %v1677_v43 = vmul.f32 %v1675_v3, %v2747_v55 }
 0xa21   : > { %v2370_v53 = vpop.eup %2369  ;;  %v1679_v4 = vadd.f32 1e-05, %v1677_v43 }
 0xa22   : > { %v1681_v5 = vmul.f32 %v2370_v53, %v1678_v2  ;;  %vm1687_vm5 = vweird.f32 %v2370_v53 }
 0xa23   : > { %2371 = vrsqrt.f32 %v1679_v4  ;;  %vm1688_vm7 = vmor %vm1686_vm6, %vm1687_vm5  ;;  %vm1696_vm9 = vweird.f32 %v1679_v4 }
 0xa24   : > { %v1682_v6 = vmul.f32 %v2370_v53, %v1681_v5 }
 0xa26   : > { %v1683_v7 = vmul.f32 0.5, %v1682_v6 }
 0xa28   : > { %v1684_v8 = vsub.f32 1.5, %v1683_v7 }
 0xa29   : > { %v2372_v9 = vpop.eup %2371 }
 0xa2a   : > { %v1685_v10 = vmul.f32 %v2370_v53, %v1684_v8  ;;  %v1691_v11 = vmul.f32 %v2372_v9, %v1679_v4  ;;  %vm1697_vm8 = vweird.f32 %v2372_v9 }
 0xa2b   : > { %vm1698_vm10 = vmor %vm1696_vm9, %vm1697_vm8 }
 0xa2c   : > { %v1692_v12 = vmul.f32 %v2372_v9, %v1691_v11  ;;  %v1689_v13 = vsel %vm1688_vm7, %v2370_v53, %v1685_v10  ;;  %v2334_v11 = vld [vmem:[%s2853_s29] ss:$0 sm:$0xff] }
 0xa2d   : > { %v1700_v20 = vmul.f32 %v1689_v13, %v1666_v58 }
 0xa2e   : > { %v1693_v14 = vmul.f32 0.5, %v1692_v12 }
 0xa2f   : > { %v1705_v24 = vmul.f32 %v2329_v19, %v1700_v20 }
 0xa30   : > { %v1694_v18 = vsub.f32 1.5, %v1693_v14 }
 0xa31   : > { %v1710_v27 = vadd.f32 %v2330_v23, %v1705_v24 }
 0xa32   : > { %v1695_v21 = vmul.f32 %v2372_v9, %v1694_v18 }
 0xa34   : > { %v1699_v22 = vsel %vm1698_vm10, %v2372_v9, %v1695_v21  ;;  %v2333_v9 = vld [vmem:[%s652_s27] ss:$0 sm:$0xff] }
 0xa35   : > { %v1701_v25 = vmul.f32 %v1699_v22, %v1667_v62 }
 0xa37   : > { %v1706_v26 = vmul.f32 %v2329_v19, %v1701_v25 }
 0xa39   : > { %v1711_v28 = vadd.f32 %v2330_v23, %v1706_v26 }
 0xa3b   : > { %v1712_v29 = vpack.c.bf16 %v1711_v28, %v1710_v27 }
 0xa3d   : > { %2240 = vmatmul.msk.bf16.vlgmr.msra.gmra.mxu0 %vm698_vm1, %v1712_v29 }
 0xaba   : > { %v1745_v34 = vpop.f32.mrf.mxu0 }
 0xabb   : > { %v1746_v36 = vadd.f32 %v2331_v35, %v1745_v34 }
 0xabd   : > { %v1750_v39 = vmax.f32 %v1746_v36, 0.0 }
 0xac2   : > { %v1747_v37 = vpop.f32.mrf.mxu0 }
 0xac3   : > { %v1748_v38 = vadd.f32 %v2331_v35, %v1747_v37 }
 0xac5   : > { %v1751_v40 = vmax.f32 %v1748_v38, 0.0 }
 0xac7   : > { %v1752_v41 = vpack.c.bf16 %v1751_v40, %v1750_v39 }
 0xac9   : > { %2257 = vmatmul.msk.bf16.vlgmr.msra.gmra.mxu1 %vm1789_vm11, %v1752_v41 }
 0xb46   : > { %v1802_v45 = vpop.f32.mrf.mxu1 }
 0xb47   : > { %v1803_v46 = vadd.f32 %v2332_v44, %v1802_v45 }
 0xb49   : > { %v1807_v47 = vadd.f32 %v1803_v46, %v1710_v27 }
 0xb4b   : > { %v1811_v48 = vsel %vm698_vm1, %v1807_v47, 0.0 }
 0xb4c   : > { %1812 = vadd.xlane.f32.xlu2 %v1811_v48 }
 0xb4e   : > { %v1804_v49 = vpop.f32.mrf.mxu1 }
 0xb4f   : > { %v1805_v50 = vadd.f32 %v2332_v44, %v1804_v49 }
 0xb51   : > { %v1808_v51 = vadd.f32 %v1805_v50, %v1711_v28 }
 0xb53   : > { %v1814_v54 = vsel %vm698_vm1, %v1808_v51, 0.0 }
 0xb54   : > { %1815 = vadd.xlane.f32.xlu0 %v1814_v54 }
 0xbbf   : > { %v1813_v15 = vpop.xlane.xlu2 %1812 }
 0xbc0   : > { %v1817_v56 = vmul.f32 %v1813_v15, %v2747_v55 }
 0xbc2   : > { %v1819_v57 = vsub.f32 %v1807_v47, %v1817_v56 }
 0xbc4   : > { %v1821_v58 = vmul.f32 %v1819_v57, %v1819_v57 }
 0xbc6   : > { %v1823_v16 = vsel %vm698_vm1, %v1821_v58, 0.0 }
 0xbc7   : > { %v1816_v59 = vpop.xlane.xlu0 %1815  ;;  %1824 = vadd.xlane.f32.xlu1 %v1823_v16 }
 0xbc8   : > { %v1818_v60 = vmul.f32 %v1816_v59, %v2747_v55 }
 0xbca   : > { %v1820_v61 = vsub.f32 %v1808_v51, %v1818_v60 }
 0xbcc   : > { %v1822_v62 = vmul.f32 %v1820_v61, %v1820_v61 }
 0xbce   : > { %v1826_v42 = vsel %vm698_vm1, %v1822_v62, 0.0 }
 0xbcf   : > { %1827 = vadd.xlane.f32.xlu2 %v1826_v42 }
 0xc3a   : > { %v1825_v52 = vpop.xlane.xlu1 %1824 }
 0xc3b   : > { %v1829_v63 = vmul.f32 %v1825_v52, %v2747_v55 }
 0xc3d   : > { %v1831_v0 = vadd.f32 1e-05, %v1829_v63 }
 0xc3f   : > { %2373 = vrsqrt.f32 %v1831_v0  ;;  %vm1839_vm13 = vweird.f32 %v1831_v0 }
 0xc42   : > { %v1828_v1 = vpop.xlane.xlu2 %1827 }
 0xc43   : > { %v1830_v17 = vmul.f32 %v1828_v1, %v2747_v55 }
 0xc45   : > { %v2374_v2 = vpop.eup %2373  ;;  %v1832_v3 = vadd.f32 1e-05, %v1830_v17 }
 0xc46   : > { %v1834_v43 = vmul.f32 %v2374_v2, %v1831_v0  ;;  %vm1840_vm12 = vweird.f32 %v2374_v2 }
 0xc47   : > { %2375 = vrsqrt.f32 %v1832_v3  ;;  %vm1841_vm14 = vmor %vm1839_vm13, %vm1840_vm12  ;;  %vm1849_vm0 = vweird.f32 %v1832_v3 }
 0xc48   : > { %v1835_v53 = vmul.f32 %v2374_v2, %v1834_v43 }
 0xc4a   : > { %v1836_v4 = vmul.f32 0.5, %v1835_v53 }
 0xc4c   : > { %v1837_v5 = vsub.f32 1.5, %v1836_v4 }
 0xc4d   : > { %v2376_v6 = vpop.eup %2375 }
 0xc4e   : > { %v1838_v7 = vmul.f32 %v2374_v2, %v1837_v5  ;;  %v1844_v8 = vmul.f32 %v2376_v6, %v1832_v3  ;;  %vm1850_vm15 = vweird.f32 %v2376_v6 }
 0xc4f   : > { %vm1851_vm2 = vmor %vm1849_vm0, %vm1850_vm15 }
 0xc50   : > { %v1842_v55 = vsel %vm1841_vm14, %v2374_v2, %v1838_v7  ;;  %v1845_v10 = vmul.f32 %v2376_v6, %v1844_v8 }
 0xc51   : > { %v1853_v12 = vmul.f32 %v1842_v55, %v1819_v57 }
 0xc52   : > { %v1846_v13 = vmul.f32 0.5, %v1845_v10 }
 0xc53   : > { %v1858_v14 = vmul.f32 %v2333_v9, %v1853_v12 }
 0xc54   : > { %v1847_v18 = vsub.f32 1.5, %v1846_v13 }
 0xc55   : > { %v1863_v19 = vadd.f32 %v2334_v11, %v1858_v14 }
 0xc56   : > { %v1848_v20 = vmul.f32 %v2376_v6, %v1847_v18 }
 0xc57   : > { %1865 = vst.msk [vmem:[#allocation2] sm:$0xff] %vm698_vm1, %v1863_v19 }
 0xc58   : > { %v1852_v21 = vsel %vm1851_vm2, %v2376_v6, %v1848_v20 }
 0xc59   : > { %v1854_v22 = vmul.f32 %v1852_v21, %v1820_v61 }
 0xc5b   : > { %v1859_v23 = vmul.f32 %v2333_v9, %v1854_v22  ;;  %1870 = sbr.rel (%p2258_p5) target bundleno = 3170 (0xc62), region = 88 }
 0xc5d   : > { %v1864_v24 = vadd.f32 %v2334_v11, %v1859_v23 }
 0xc5f   : > { %1866 = vst.msk [vmem:[#allocation2 + $0x8] sm:$0xff] %vm698_vm1, %v1864_v24 }
 0xc60   : > { %1871 = vst.msk [vmem:[#allocation3] sm:$0xff] %vm698_vm1, %v1863_v19 }
 0xc61   : > { %1872 = vst.msk [vmem:[#allocation3 + $0x8] sm:$0xff] %vm698_vm1, %v1864_v24 }
 0xc62 PF: > { %p2302_p6 = scmp.eq.s32.totalorder %s2507_s19, 1  ;;  %s2418_s20 = smov [#allocation3]  }
 0xc63   : > { %s1878_s27 = sshll.u32 %s2418_s20, 4  ;;  %s2854_s28 = sld [smem:[#allocation14_spill]]  ;;  %s1879_s27 = int_to_ptr.vmem [resolvable:$true] %s1878_s27 }
 0xc64   : > { %s2419_s16 = smov 128   ;;  %s2420_s18 = smov 8  }
 0xc69   : > { %s1880_s30 = sshll.u32 %s2854_s28, 4  ;;  %s1881_s30 = int_to_ptr.hbm [resolvable:$true] %s1880_s30 }
 0xc6a   : > { %2299 = dma.vmem_to_hbm [thread:$0]  (%p2302_p6), %s1879_s27, 256, %s1881_s30, [#allocation4], %s2419_s16, %s2419_s16, %s2420_s18  }
 0xc6b   : > { %2410 = dma.done.wait (%p2302_p6), [#allocation4], 256  }
 0xc6c   : > { %2412 = vsyncadd (%p2302_p6), [#allocation4], 4294967040 }
 0xc6d PF: > { %s2855_s15 = sld [smem:[#allocation6_spill]] }
 0xc73   : > { %s26_s18 = sadd.s32 1, %s2855_s15  }
 0xc74   : > { %p23_p7 = scmp.ge.s32.totalorder %s26_s18, 4  }
 0xc76   :  { %25 = sbr.rel (!%p23_p7) target bundleno = 9 (0x9), region = 173 }
 0xc7b   :  { %1897 = vsyncpa [#allocation4], 1 }
 0xc7c   :  { %1899 = vsyncpa [#allocation4 + $0x1], 1 }

</bundles_post_ra>
